<compile_context>
chip_gen: v7x
topology: tpu7x:2x2x1
jax: 0.10.0
libtpu: 0.0.40
codegen_flags: <defaults>
</compile_context>

<pallas_src>
import functools
import math

import jax
import jax.numpy as jnp
from jax.experimental import pallas as pl
from jax.experimental.pallas import tpu as pltpu


def _round_up(n, m):
  return ((n + m - 1) // m) * m


def _erf_f32(x):
  """XLA/Eigen float32 rational approximation of erf (VPU ops + one EUP recip)."""
  alpha = (-2.72614225801306e-10, 2.77068142495902e-08, -2.10102402082508e-06,
           -5.69250639462346e-05, -7.34990630326855e-04, -2.954600054904e-03,
           -1.60960333262415e-02)
  beta = (-1.45660718464996e-05, -2.13374055278905e-04, -1.68282697438203e-03,
          -7.37332916720468e-03, -1.42647390514189e-02)
  x = jnp.clip(x, -4.0, 4.0)
  x2 = x * x
  p = alpha[0]
  for c in alpha[1:]:
    p = p * x2 + c
  q = beta[0]
  for c in beta[1:]:
    q = q * x2 + c
  # q is bounded away from zero; route the divide to the EUP (frees VALU slots).
  return (x * p) * pl.reciprocal(q, approx=True)


def _gelu_exact(x):
  # torch.nn.GELU() default ('none'): 0.5 * x * (1 + erf(x / sqrt(2)))
  return 0.5 * x * (1.0 + _erf_f32(x * (1.0 / math.sqrt(2.0))))


def _residual_readout_kernel(num_residuals, eps,
                             x_ref, fa_ref, fb_ref,
                             wz0_ref, bz0_ref, wz1_ref, bz1_ref,
                             gamma_ref, beta_ref, wl_ref, bl_ref,
                             out_ref):
  """One grid program = one (batch, sequence-tile) block.

  MXU dots take bf16 operands with f32 accumulation; LayerNorm / FiLM math is f32.
  LayerNorm statistics are one-pass and the affine + FiLM are fused to scale/shift.
  """
  E = gamma_ref.shape[-1]
  inv_e = 1.0 / float(E)

  x0 = x_ref[0]                               # (TL, E)  f32
  f_a = fa_ref[0]                             # (1, E)   f32
  f_b = fb_ref[0]                             # (1, E)

  # Loop-invariant FiLM/LayerNorm combinations (hoisted; JAX won't CSE broadcasts).
  fg = f_a * gamma_ref[...]                   # (1, E)
  fbb = f_a * beta_ref[...] + f_b             # (1, E)

  def body(_, x):
    # z = z_layer(x) = MLP([mlp_dim, E], GELU)(x)
    zh = _gelu_exact(
        jnp.dot(x.astype(jnp.bfloat16), wz0_ref[...],
                preferred_element_type=jnp.float32) + bz0_ref[...])
    z = jnp.dot(zh.astype(jnp.bfloat16), wz1_ref[...],
                preferred_element_type=jnp.float32) + bz1_ref[...]
    y = x + z
    # Single-pass LayerNorm statistics.
    s1 = jnp.sum(y, axis=-1, keepdims=True)
    s2 = jnp.sum(y * y, axis=-1, keepdims=True)
    mu = s1 * inv_e
    var = jnp.maximum(s2 * inv_e - mu * mu, 0.0)
    inv_std = jax.lax.rsqrt(var + eps)
    # Fused LayerNorm affine + FiLM:  f_a*((y - mu)*inv_std*gamma + beta) + f_b
    scale = fg * inv_std                       # (TL, E)
    return y * scale + (fbb - mu * scale)

  x = jax.lax.fori_loop(0, num_residuals, body, x0, unroll=True)

  logits = jnp.dot(x.astype(jnp.bfloat16), wl_ref[...],
                   preferred_element_type=jnp.float32) + bl_ref[...]
  out_ref[0] = logits.astype(out_ref.dtype)


def residual_readout(x, temb, params, num_residuals, seq_tile=256):
  """ResidualReadout forward: x (B, L, E), temb (B, E)  ->  logits (B, L, V)."""
  B, L, E = x.shape
  V = params["wl"].shape[-1]
  mlp = params["wz0"].shape[-1]

  # Tile-friendly / lane-dense padded sizes.
  Vp = _round_up(V, 128)                      # lane-dense output (unmasked stores)
  TL = _round_up(min(seq_tile, L), 8)         # sequence tile (sublane multiple)
  Lp = _round_up(L, TL)
  n_lt = Lp // TL

  # ---- Hoisted temb path: M=1 matmuls are cheaper in plain XLA than on padded MXU tiles.
  gelu = lambda v: jax.nn.gelu(v, approximate=False)
  t = gelu(temb @ params["w0"] + params["b0"])
  t4 = t @ params["w1"] + params["b1"]
  film = t4 @ params["wf"] + params["bf"]                      # (B, 2E)
  f_a = film[:, :E].reshape(B, 1, E).astype(jnp.float32)
  f_b = film[:, E:].reshape(B, 1, E).astype(jnp.float32)

  # ---- Pad sequence (grid tiling) and vocab (lane-dense stores).  Padding is zeros,
  #      so padded rows/columns stay finite and are sliced away below.
  x_p = x.astype(jnp.float32)
  if Lp != L:
    x_p = jnp.pad(x_p, ((0, 0), (0, Lp - L), (0, 0)))
  wl_p = jnp.pad(params["wl"], ((0, 0), (0, Vp - V)))
  bl_p = jnp.pad(params["bl"], ((0, 0), (0, Vp - V)))

  # bf16 MXU operands; biases / LayerNorm affine stay f32.
  weights = [
      params["wz0"].astype(jnp.bfloat16), params["bz0"].astype(jnp.float32),
      params["wz1"].astype(jnp.bfloat16), params["bz1"].astype(jnp.float32),
      params["gamma"].astype(jnp.float32), params["beta"].astype(jnp.float32),
      wl_p.astype(jnp.bfloat16), bl_p.astype(jnp.float32),
  ]
  w_bytes = sum(int(w.nbytes) for w in weights)

  kernel = functools.partial(_residual_readout_kernel, num_residuals, 1e-5)

  cost = pl.CostEstimate(
      flops=int(B * Lp * (num_residuals * 4 * E * mlp + 2 * E * Vp)),
      transcendentals=int(B * Lp * num_residuals * mlp),
      bytes_accessed=int(x_p.nbytes) + int(f_a.nbytes) + int(f_b.nbytes)
                     + w_bytes + B * Lp * Vp * 4)

  # VMEM budget: double-buffered activation blocks + weights + intermediates headroom.
  vmem_est = (2 * (TL * E * 4 + TL * Vp * 4 + 2 * E * 4)
              + 2 * w_bytes + 6 * TL * mlp * 4)
  compiler_params = pltpu.CompilerParams(
      dimension_semantics=("parallel", "parallel"),
      vmem_limit_bytes=int(min(max(vmem_est, 32 * 1024 * 1024),
                               64 * 1024 * 1024)))

  out_shape = jax.ShapeDtypeStruct((B, Lp, Vp), jnp.float32)
  x_spec = pl.BlockSpec((1, TL, E), lambda b, l: (b, l, 0))
  film_spec = pl.BlockSpec((1, 1, E), lambda b, l: (b, 0, 0))
  out_spec = pl.BlockSpec((1, TL, Vp), lambda b, l: (b, l, 0))

  def _call(single_buffer_weights):
    w_kwargs = (dict(pipeline_mode=pl.Buffered(1))
                if single_buffer_weights else {})
    weight_specs = [pl.BlockSpec(w.shape, lambda b, l: (0, 0), **w_kwargs)
                    for w in weights]
    return pl.pallas_call(
        kernel,
        out_shape=out_shape,
        grid=(B, n_lt),
        in_specs=[x_spec, film_spec, film_spec] + weight_specs,
        out_specs=out_spec,
        compiler_params=compiler_params,
        cost_estimate=cost,
    )(x_p, f_a, f_b, *weights)

  try:
    # Weights have a constant index_map: single-buffer them to halve their VMEM.
    out = _call(True)
  except Exception:
    # Fall back to default double buffering if this Pallas build rejects Buffered(1).
    out = _call(False)

  return out[:, :L, :V]


def residual_readout_ref(x, temb, p, num_residuals, eps=1e-5):
  """Pure-JAX f32 reference (exact erf GELU) for validation."""
  gelu = lambda v: jax.nn.gelu(v, approximate=False)
  t = gelu(temb @ p["w0"] + p["b0"])
  t = t @ p["w1"] + p["b1"]
  film = t @ p["wf"] + p["bf"]                 # (B, 2E)
  E = x.shape[-1]
  a = film[:, None, :E]
  b = film[:, None, E:]
  for _ in range(num_residuals):
    z = gelu(x @ p["wz0"] + p["bz0"]) @ p["wz1"] + p["bz1"]
    y = x + z
    mu = jnp.mean(y, axis=-1, keepdims=True)
    var = jnp.mean(jnp.square(y - mu), axis=-1, keepdims=True)
    y = (y - mu) * jax.lax.rsqrt(var + eps) * p["gamma"] + p["beta"]
    x = a * y + b
  return x @ p["wl"] + p["bl"]


if __name__ == "__main__":
  B, L = 2, 20                 # L deliberately not a tile multiple: exercises padding
  embed_dim, mlp_dim, vocab_size = 32, 64, 16
  num_output_ffresiduals = 2

  key = jax.random.PRNGKey(0)
  keys = jax.random.split(key, 16)
  scale = 0.2

  def w(k, shape):
    return (scale * jax.random.normal(k, shape)).astype(jnp.float32)

  params = {
      # self.mlp = MLP([mlp_dim, 4*embed_dim], GELU): Linear(E->mlp), Linear(mlp->4E)
      "w0": w(keys[0], (embed_dim, mlp_dim)),
      "b0": w(keys[1], (1, mlp_dim)),
      "w1": w(keys[2], (mlp_dim, 4 * embed_dim)),
      "b1": w(keys[3], (1, 4 * embed_dim)),
      # film_params_layer: Linear(4E -> 2E)  (input dim follows self.mlp output)
      "wf": w(keys[4], (4 * embed_dim, 2 * embed_dim)),
      "bf": w(keys[5], (1, 2 * embed_dim)),
      # z_layer = MLP([mlp_dim, embed_dim], GELU): Linear(E->mlp), Linear(mlp->E)
      "wz0": w(keys[6], (embed_dim, mlp_dim)),
      "bz0": w(keys[7], (1, mlp_dim)),
      "wz1": w(keys[8], (mlp_dim, embed_dim)),
      "bz1": w(keys[9], (1, embed_dim)),
      # norm_layer = nn.LayerNorm(embed_dim): torch default init (weight=1, bias=0)
      "gamma": jnp.ones((1, embed_dim), jnp.float32),
      "beta": jnp.zeros((1, embed_dim), jnp.float32),
      # logits_layer: Linear(E -> vocab_size)
      "wl": w(keys[10], (embed_dim, vocab_size)),
      "bl": w(keys[11], (1, vocab_size)),
  }

  x = jax.random.normal(keys[12], (B, L, embed_dim), dtype=jnp.float32)
  temb = jax.random.normal(keys[13], (B, embed_dim), dtype=jnp.float32)

  # seq_tile=8 forces multiple sequence tiles at this small L to exercise the grid.
  out = residual_readout(x, temb, params, num_output_ffresiduals, seq_tile=8)
  out = jax.block_until_ready(out)

  ref = residual_readout_ref(x, temb, params, num_output_ffresiduals)
  assert out.shape == (B, L, vocab_size)
  max_diff = float(jnp.max(jnp.abs(out - ref)))
  assert bool(jnp.allclose(out, ref, rtol=5e-2, atol=5e-2)), (
      "max abs diff = %f" % max_diff)
  print("KERNEL_OK")
</pallas_src>

<mosaic_0001>
module attributes {stable_mosaic.version = 11 : i64} {
  func.func @_residual_readout_kernel(%arg0: i32, %arg1: i32, %arg2: memref<1x8x32xf32, #tpu.memory_space<vmem>>, %arg3: memref<1x1x32xf32, #tpu.memory_space<vmem>>, %arg4: memref<1x1x32xf32, #tpu.memory_space<vmem>>, %arg5: memref<32x64xbf16, #tpu.memory_space<vmem>>, %arg6: memref<1x64xf32, #tpu.memory_space<vmem>>, %arg7: memref<64x32xbf16, #tpu.memory_space<vmem>>, %arg8: memref<1x32xf32, #tpu.memory_space<vmem>>, %arg9: memref<1x32xf32, #tpu.memory_space<vmem>>, %arg10: memref<1x32xf32, #tpu.memory_space<vmem>>, %arg11: memref<32x128xbf16, #tpu.memory_space<vmem>>, %arg12: memref<1x128xf32, #tpu.memory_space<vmem>>, %arg13: memref<1x8x128xf32, #tpu.memory_space<vmem>>) attributes {dimension_semantics = [#tpu.dimension_semantics<parallel>, #tpu.dimension_semantics<parallel>], iteration_bounds = array<i64: 2, 3>, scalar_prefetch = 0 : i64, scratch_operands = 0 : i64, tpu.core_type = #tpu.core_type<tc>, window_params = [{transform_indices = @transform_0, window_bounds = array<i64: 1, 8, 32>}, {transform_indices = @transform_1, window_bounds = array<i64: 1, 1, 32>}, {transform_indices = @transform_2, window_bounds = array<i64: 1, 1, 32>}, {pipeline_mode = #tpu.pipeline_mode<synchronous>, transform_indices = @transform_3, window_bounds = array<i64: 32, 64>}, {pipeline_mode = #tpu.pipeline_mode<synchronous>, transform_indices = @transform_4, window_bounds = array<i64: 1, 64>}, {pipeline_mode = #tpu.pipeline_mode<synchronous>, transform_indices = @transform_5, window_bounds = array<i64: 64, 32>}, {pipeline_mode = #tpu.pipeline_mode<synchronous>, transform_indices = @transform_6, window_bounds = array<i64: 1, 32>}, {pipeline_mode = #tpu.pipeline_mode<synchronous>, transform_indices = @transform_7, window_bounds = array<i64: 1, 32>}, {pipeline_mode = #tpu.pipeline_mode<synchronous>, transform_indices = @transform_8, window_bounds = array<i64: 1, 32>}, {pipeline_mode = #tpu.pipeline_mode<synchronous>, transform_indices = @transform_9, window_bounds = array<i64: 32, 128>}, {pipeline_mode = #tpu.pipeline_mode<synchronous>, transform_indices = @transform_10, window_bounds = array<i64: 1, 128>}, {transform_indices = @transform_11, window_bounds = array<i64: 1, 8, 128>}]} {
    %c0 = arith.constant 0 : index
    %c0_0 = arith.constant 0 : index
    %c0_1 = arith.constant 0 : index
    %0 = vector.load %arg2[%c0, %c0_0, %c0_1] : memref<1x8x32xf32, #tpu.memory_space<vmem>>, vector<1x8x32xf32>
    %1 = vector.shape_cast %0 : vector<1x8x32xf32> to vector<8x32xf32>
    %c0_2 = arith.constant 0 : index
    %c0_3 = arith.constant 0 : index
    %c0_4 = arith.constant 0 : index
    %2 = vector.load %arg3[%c0_2, %c0_3, %c0_4] : memref<1x1x32xf32, #tpu.memory_space<vmem>>, vector<1x1x32xf32>
    %3 = vector.shape_cast %2 : vector<1x1x32xf32> to vector<1x32xf32>
    %c0_5 = arith.constant 0 : index
    %c0_6 = arith.constant 0 : index
    %c0_7 = arith.constant 0 : index
    %4 = vector.load %arg4[%c0_5, %c0_6, %c0_7] : memref<1x1x32xf32, #tpu.memory_space<vmem>>, vector<1x1x32xf32>
    %5 = vector.shape_cast %4 : vector<1x1x32xf32> to vector<1x32xf32>
    %c0_8 = arith.constant 0 : index
    %c0_9 = arith.constant 0 : index
    %6 = vector.load %arg9[%c0_8, %c0_9] : memref<1x32xf32, #tpu.memory_space<vmem>>, vector<1x32xf32>
    %7 = arith.mulf %3, %6 : vector<1x32xf32>
    %c0_10 = arith.constant 0 : index
    %c0_11 = arith.constant 0 : index
    %8 = vector.load %arg10[%c0_10, %c0_11] : memref<1x32xf32, #tpu.memory_space<vmem>>, vector<1x32xf32>
    %9 = arith.mulf %3, %8 : vector<1x32xf32>
    %10 = arith.addf %9, %5 : vector<1x32xf32>
    %c0_i32 = arith.constant 0 : i32
    %11 = arith.truncf %1 : vector<8x32xf32> to vector<8x32xbf16>
    %c0_12 = arith.constant 0 : index
    %c0_13 = arith.constant 0 : index
    %12 = vector.load %arg5[%c0_12, %c0_13] : memref<32x64xbf16, #tpu.memory_space<vmem>>, vector<32x64xbf16>
    %cst = arith.constant dense<0.000000e+00> : vector<8x64xf32>
    %13 = tpu.matmul %11, %12, %cst {dimension_numbers = #tpu.dot_dimension_numbers<[1], [0], [0], [1], [0, 0, 1, 1], [], []>} : vector<8x32xbf16>, vector<32x64xbf16>, vector<8x64xf32> -> vector<8x64xf32>
    %c0_14 = arith.constant 0 : index
    %c0_15 = arith.constant 0 : index
    %14 = vector.load %arg6[%c0_14, %c0_15] : memref<1x64xf32, #tpu.memory_space<vmem>>, vector<1x64xf32>
    %15 = vector.broadcast %14 : vector<1x64xf32> to vector<8x64xf32>
    %16 = arith.addf %13, %15 : vector<8x64xf32>
    %cst_16 = arith.constant 5.000000e-01 : f32
    %17 = vector.broadcast %cst_16 : f32 to vector<8x64xf32>
    %18 = arith.mulf %17, %16 : vector<8x64xf32>
    %cst_17 = arith.constant 0.707106769 : f32
    %19 = vector.broadcast %cst_17 : f32 to vector<8x64xf32>
    %20 = arith.mulf %16, %19 : vector<8x64xf32>
    %cst_18 = arith.constant -4.000000e+00 : f32
    %cst_19 = arith.constant 4.000000e+00 : f32
    %21 = vector.broadcast %cst_18 : f32 to vector<8x64xf32>
    %22 = arith.maximumf %21, %20 : vector<8x64xf32>
    %23 = vector.broadcast %cst_19 : f32 to vector<8x64xf32>
    %24 = arith.minimumf %23, %22 : vector<8x64xf32>
    %25 = arith.mulf %24, %24 : vector<8x64xf32>
    %cst_20 = arith.constant -2.72614237E-10 : f32
    %26 = vector.broadcast %cst_20 : f32 to vector<8x64xf32>
    %27 = arith.mulf %26, %25 : vector<8x64xf32>
    %cst_21 = arith.constant 2.77068146E-8 : f32
    %28 = vector.broadcast %cst_21 : f32 to vector<8x64xf32>
    %29 = arith.addf %27, %28 : vector<8x64xf32>
    %30 = arith.mulf %29, %25 : vector<8x64xf32>
    %cst_22 = arith.constant -2.10102394E-6 : f32
    %31 = vector.broadcast %cst_22 : f32 to vector<8x64xf32>
    %32 = arith.addf %30, %31 : vector<8x64xf32>
    %33 = arith.mulf %32, %25 : vector<8x64xf32>
    %cst_23 = arith.constant -5.69250624E-5 : f32
    %34 = vector.broadcast %cst_23 : f32 to vector<8x64xf32>
    %35 = arith.addf %33, %34 : vector<8x64xf32>
    %36 = arith.mulf %35, %25 : vector<8x64xf32>
    %cst_24 = arith.constant -7.34990637E-4 : f32
    %37 = vector.broadcast %cst_24 : f32 to vector<8x64xf32>
    %38 = arith.addf %36, %37 : vector<8x64xf32>
    %39 = arith.mulf %38, %25 : vector<8x64xf32>
    %cst_25 = arith.constant -0.00295460015 : f32
    %40 = vector.broadcast %cst_25 : f32 to vector<8x64xf32>
    %41 = arith.addf %39, %40 : vector<8x64xf32>
    %42 = arith.mulf %41, %25 : vector<8x64xf32>
    %cst_26 = arith.constant -0.0160960332 : f32
    %43 = vector.broadcast %cst_26 : f32 to vector<8x64xf32>
    %44 = arith.addf %42, %43 : vector<8x64xf32>
    %cst_27 = arith.constant -1.45660715E-5 : f32
    %45 = vector.broadcast %cst_27 : f32 to vector<8x64xf32>
    %46 = arith.mulf %45, %25 : vector<8x64xf32>
    %cst_28 = arith.constant -2.13374049E-4 : f32
    %47 = vector.broadcast %cst_28 : f32 to vector<8x64xf32>
    %48 = arith.addf %46, %47 : vector<8x64xf32>
    %49 = arith.mulf %48, %25 : vector<8x64xf32>
    %cst_29 = arith.constant -0.00168282702 : f32
    %50 = vector.broadcast %cst_29 : f32 to vector<8x64xf32>
    %51 = arith.addf %49, %50 : vector<8x64xf32>
    %52 = arith.mulf %51, %25 : vector<8x64xf32>
    %cst_30 = arith.constant -0.00737332925 : f32
    %53 = vector.broadcast %cst_30 : f32 to vector<8x64xf32>
    %54 = arith.addf %52, %53 : vector<8x64xf32>
    %55 = arith.mulf %54, %25 : vector<8x64xf32>
    %cst_31 = arith.constant -0.0142647391 : f32
    %56 = vector.broadcast %cst_31 : f32 to vector<8x64xf32>
    %57 = arith.addf %55, %56 : vector<8x64xf32>
    %58 = arith.mulf %24, %44 : vector<8x64xf32>
    %59 = tpu.reciprocal %57 {approx = true} : vector<8x64xf32> -> vector<8x64xf32>
    %60 = arith.mulf %58, %59 : vector<8x64xf32>
    %cst_32 = arith.constant 1.000000e+00 : f32
    %61 = vector.broadcast %cst_32 : f32 to vector<8x64xf32>
    %62 = arith.addf %61, %60 : vector<8x64xf32>
    %63 = arith.mulf %18, %62 : vector<8x64xf32>
    %64 = arith.truncf %63 : vector<8x64xf32> to vector<8x64xbf16>
    %c0_33 = arith.constant 0 : index
    %c0_34 = arith.constant 0 : index
    %65 = vector.load %arg7[%c0_33, %c0_34] : memref<64x32xbf16, #tpu.memory_space<vmem>>, vector<64x32xbf16>
    %cst_35 = arith.constant dense<0.000000e+00> : vector<8x32xf32>
    %66 = tpu.matmul %64, %65, %cst_35 {dimension_numbers = #tpu.dot_dimension_numbers<[1], [0], [0], [1], [0, 0, 1, 1], [], []>} : vector<8x64xbf16>, vector<64x32xbf16>, vector<8x32xf32> -> vector<8x32xf32>
    %c0_36 = arith.constant 0 : index
    %c0_37 = arith.constant 0 : index
    %67 = vector.load %arg8[%c0_36, %c0_37] : memref<1x32xf32, #tpu.memory_space<vmem>>, vector<1x32xf32>
    %68 = vector.broadcast %67 : vector<1x32xf32> to vector<8x32xf32>
    %69 = arith.addf %66, %68 : vector<8x32xf32>
    %70 = arith.addf %1, %69 : vector<8x32xf32>
    %cst_38 = arith.constant dense<0.000000e+00> : vector<8xf32>
    %71 = vector.multi_reduction <add>, %70, %cst_38 [1] : vector<8x32xf32> to vector<8xf32>
    %72 = vector.shape_cast %71 : vector<8xf32> to vector<8x1xf32>
    %73 = arith.mulf %70, %70 : vector<8x32xf32>
    %cst_39 = arith.constant dense<0.000000e+00> : vector<8xf32>
    %74 = vector.multi_reduction <add>, %73, %cst_39 [1] : vector<8x32xf32> to vector<8xf32>
    %75 = vector.shape_cast %74 : vector<8xf32> to vector<8x1xf32>
    %cst_40 = arith.constant 3.125000e-02 : f32
    %76 = vector.broadcast %cst_40 : f32 to vector<8x1xf32>
    %77 = arith.mulf %72, %76 : vector<8x1xf32>
    %cst_41 = arith.constant 3.125000e-02 : f32
    %78 = vector.broadcast %cst_41 : f32 to vector<8x1xf32>
    %79 = arith.mulf %75, %78 : vector<8x1xf32>
    %80 = arith.mulf %77, %77 : vector<8x1xf32>
    %81 = arith.subf %79, %80 : vector<8x1xf32>
    %cst_42 = arith.constant 0.000000e+00 : f32
    %82 = vector.broadcast %cst_42 : f32 to vector<8x1xf32>
    %83 = arith.maximumf %81, %82 : vector<8x1xf32>
    %cst_43 = arith.constant 9.99999974E-6 : f32
    %84 = vector.broadcast %cst_43 : f32 to vector<8x1xf32>
    %85 = arith.addf %83, %84 : vector<8x1xf32>
    %86 = math.rsqrt %85 : vector<8x1xf32>
    %87 = vector.broadcast %7 : vector<1x32xf32> to vector<8x32xf32>
    %88 = vector.broadcast %86 : vector<8x1xf32> to vector<8x32xf32>
    %89 = arith.mulf %87, %88 : vector<8x32xf32>
    %90 = arith.mulf %70, %89 : vector<8x32xf32>
    %91 = vector.broadcast %77 : vector<8x1xf32> to vector<8x32xf32>
    %92 = arith.mulf %91, %89 : vector<8x32xf32>
    %93 = vector.broadcast %10 : vector<1x32xf32> to vector<8x32xf32>
    %94 = arith.subf %93, %92 : vector<8x32xf32>
    %95 = arith.addf %90, %94 : vector<8x32xf32>
    %c1_i32 = arith.constant 1 : i32
    %96 = arith.truncf %95 : vector<8x32xf32> to vector<8x32xbf16>
    %c0_44 = arith.constant 0 : index
    %c0_45 = arith.constant 0 : index
    %97 = vector.load %arg5[%c0_44, %c0_45] : memref<32x64xbf16, #tpu.memory_space<vmem>>, vector<32x64xbf16>
    %cst_46 = arith.constant dense<0.000000e+00> : vector<8x64xf32>
    %98 = tpu.matmul %96, %97, %cst_46 {dimension_numbers = #tpu.dot_dimension_numbers<[1], [0], [0], [1], [0, 0, 1, 1], [], []>} : vector<8x32xbf16>, vector<32x64xbf16>, vector<8x64xf32> -> vector<8x64xf32>
    %c0_47 = arith.constant 0 : index
    %c0_48 = arith.constant 0 : index
    %99 = vector.load %arg6[%c0_47, %c0_48] : memref<1x64xf32, #tpu.memory_space<vmem>>, vector<1x64xf32>
    %100 = vector.broadcast %99 : vector<1x64xf32> to vector<8x64xf32>
    %101 = arith.addf %98, %100 : vector<8x64xf32>
    %cst_49 = arith.constant 5.000000e-01 : f32
    %102 = vector.broadcast %cst_49 : f32 to vector<8x64xf32>
    %103 = arith.mulf %102, %101 : vector<8x64xf32>
    %cst_50 = arith.constant 0.707106769 : f32
    %104 = vector.broadcast %cst_50 : f32 to vector<8x64xf32>
    %105 = arith.mulf %101, %104 : vector<8x64xf32>
    %cst_51 = arith.constant -4.000000e+00 : f32
    %cst_52 = arith.constant 4.000000e+00 : f32
    %106 = vector.broadcast %cst_51 : f32 to vector<8x64xf32>
    %107 = arith.maximumf %106, %105 : vector<8x64xf32>
    %108 = vector.broadcast %cst_52 : f32 to vector<8x64xf32>
    %109 = arith.minimumf %108, %107 : vector<8x64xf32>
    %110 = arith.mulf %109, %109 : vector<8x64xf32>
    %cst_53 = arith.constant -2.72614237E-10 : f32
    %111 = vector.broadcast %cst_53 : f32 to vector<8x64xf32>
    %112 = arith.mulf %111, %110 : vector<8x64xf32>
    %cst_54 = arith.constant 2.77068146E-8 : f32
    %113 = vector.broadcast %cst_54 : f32 to vector<8x64xf32>
    %114 = arith.addf %112, %113 : vector<8x64xf32>
    %115 = arith.mulf %114, %110 : vector<8x64xf32>
    %cst_55 = arith.constant -2.10102394E-6 : f32
    %116 = vector.broadcast %cst_55 : f32 to vector<8x64xf32>
    %117 = arith.addf %115, %116 : vector<8x64xf32>
    %118 = arith.mulf %117, %110 : vector<8x64xf32>
    %cst_56 = arith.constant -5.69250624E-5 : f32
    %119 = vector.broadcast %cst_56 : f32 to vector<8x64xf32>
    %120 = arith.addf %118, %119 : vector<8x64xf32>
    %121 = arith.mulf %120, %110 : vector<8x64xf32>
    %cst_57 = arith.constant -7.34990637E-4 : f32
    %122 = vector.broadcast %cst_57 : f32 to vector<8x64xf32>
    %123 = arith.addf %121, %122 : vector<8x64xf32>
    %124 = arith.mulf %123, %110 : vector<8x64xf32>
    %cst_58 = arith.constant -0.00295460015 : f32
    %125 = vector.broadcast %cst_58 : f32 to vector<8x64xf32>
    %126 = arith.addf %124, %125 : vector<8x64xf32>
    %127 = arith.mulf %126, %110 : vector<8x64xf32>
    %cst_59 = arith.constant -0.0160960332 : f32
    %128 = vector.broadcast %cst_59 : f32 to vector<8x64xf32>
    %129 = arith.addf %127, %128 : vector<8x64xf32>
    %cst_60 = arith.constant -1.45660715E-5 : f32
    %130 = vector.broadcast %cst_60 : f32 to vector<8x64xf32>
    %131 = arith.mulf %130, %110 : vector<8x64xf32>
    %cst_61 = arith.constant -2.13374049E-4 : f32
    %132 = vector.broadcast %cst_61 : f32 to vector<8x64xf32>
    %133 = arith.addf %131, %132 : vector<8x64xf32>
    %134 = arith.mulf %133, %110 : vector<8x64xf32>
    %cst_62 = arith.constant -0.00168282702 : f32
    %135 = vector.broadcast %cst_62 : f32 to vector<8x64xf32>
    %136 = arith.addf %134, %135 : vector<8x64xf32>
    %137 = arith.mulf %136, %110 : vector<8x64xf32>
    %cst_63 = arith.constant -0.00737332925 : f32
    %138 = vector.broadcast %cst_63 : f32 to vector<8x64xf32>
    %139 = arith.addf %137, %138 : vector<8x64xf32>
    %140 = arith.mulf %139, %110 : vector<8x64xf32>
    %cst_64 = arith.constant -0.0142647391 : f32
    %141 = vector.broadcast %cst_64 : f32 to vector<8x64xf32>
    %142 = arith.addf %140, %141 : vector<8x64xf32>
    %143 = arith.mulf %109, %129 : vector<8x64xf32>
    %144 = tpu.reciprocal %142 {approx = true} : vector<8x64xf32> -> vector<8x64xf32>
    %145 = arith.mulf %143, %144 : vector<8x64xf32>
    %cst_65 = arith.constant 1.000000e+00 : f32
    %146 = vector.broadcast %cst_65 : f32 to vector<8x64xf32>
    %147 = arith.addf %146, %145 : vector<8x64xf32>
    %148 = arith.mulf %103, %147 : vector<8x64xf32>
    %149 = arith.truncf %148 : vector<8x64xf32> to vector<8x64xbf16>
    %c0_66 = arith.constant 0 : index
    %c0_67 = arith.constant 0 : index
    %150 = vector.load %arg7[%c0_66, %c0_67] : memref<64x32xbf16, #tpu.memory_space<vmem>>, vector<64x32xbf16>
    %cst_68 = arith.constant dense<0.000000e+00> : vector<8x32xf32>
    %151 = tpu.matmul %149, %150, %cst_68 {dimension_numbers = #tpu.dot_dimension_numbers<[1], [0], [0], [1], [0, 0, 1, 1], [], []>} : vector<8x64xbf16>, vector<64x32xbf16>, vector<8x32xf32> -> vector<8x32xf32>
    %c0_69 = arith.constant 0 : index
    %c0_70 = arith.constant 0 : index
    %152 = vector.load %arg8[%c0_69, %c0_70] : memref<1x32xf32, #tpu.memory_space<vmem>>, vector<1x32xf32>
    %153 = vector.broadcast %152 : vector<1x32xf32> to vector<8x32xf32>
    %154 = arith.addf %151, %153 : vector<8x32xf32>
    %155 = arith.addf %95, %154 : vector<8x32xf32>
    %cst_71 = arith.constant dense<0.000000e+00> : vector<8xf32>
    %156 = vector.multi_reduction <add>, %155, %cst_71 [1] : vector<8x32xf32> to vector<8xf32>
    %157 = vector.shape_cast %156 : vector<8xf32> to vector<8x1xf32>
    %158 = arith.mulf %155, %155 : vector<8x32xf32>
    %cst_72 = arith.constant dense<0.000000e+00> : vector<8xf32>
    %159 = vector.multi_reduction <add>, %158, %cst_72 [1] : vector<8x32xf32> to vector<8xf32>
    %160 = vector.shape_cast %159 : vector<8xf32> to vector<8x1xf32>
    %cst_73 = arith.constant 3.125000e-02 : f32
    %161 = vector.broadcast %cst_73 : f32 to vector<8x1xf32>
    %162 = arith.mulf %157, %161 : vector<8x1xf32>
    %cst_74 = arith.constant 3.125000e-02 : f32
    %163 = vector.broadcast %cst_74 : f32 to vector<8x1xf32>
    %164 = arith.mulf %160, %163 : vector<8x1xf32>
    %165 = arith.mulf %162, %162 : vector<8x1xf32>
    %166 = arith.subf %164, %165 : vector<8x1xf32>
    %cst_75 = arith.constant 0.000000e+00 : f32
    %167 = vector.broadcast %cst_75 : f32 to vector<8x1xf32>
    %168 = arith.maximumf %166, %167 : vector<8x1xf32>
    %cst_76 = arith.constant 9.99999974E-6 : f32
    %169 = vector.broadcast %cst_76 : f32 to vector<8x1xf32>
    %170 = arith.addf %168, %169 : vector<8x1xf32>
    %171 = math.rsqrt %170 : vector<8x1xf32>
    %172 = vector.broadcast %7 : vector<1x32xf32> to vector<8x32xf32>
    %173 = vector.broadcast %171 : vector<8x1xf32> to vector<8x32xf32>
    %174 = arith.mulf %172, %173 : vector<8x32xf32>
    %175 = arith.mulf %155, %174 : vector<8x32xf32>
    %176 = vector.broadcast %162 : vector<8x1xf32> to vector<8x32xf32>
    %177 = arith.mulf %176, %174 : vector<8x32xf32>
    %178 = vector.broadcast %10 : vector<1x32xf32> to vector<8x32xf32>
    %179 = arith.subf %178, %177 : vector<8x32xf32>
    %180 = arith.addf %175, %179 : vector<8x32xf32>
    %181 = arith.truncf %180 : vector<8x32xf32> to vector<8x32xbf16>
    %c0_77 = arith.constant 0 : index
    %c0_78 = arith.constant 0 : index
    %182 = vector.load %arg11[%c0_77, %c0_78] : memref<32x128xbf16, #tpu.memory_space<vmem>>, vector<32x128xbf16>
    %cst_79 = arith.constant dense<0.000000e+00> : vector<8x128xf32>
    %183 = tpu.matmul %181, %182, %cst_79 {dimension_numbers = #tpu.dot_dimension_numbers<[1], [0], [0], [1], [0, 0, 1, 1], [], []>} : vector<8x32xbf16>, vector<32x128xbf16>, vector<8x128xf32> -> vector<8x128xf32>
    %c0_80 = arith.constant 0 : index
    %c0_81 = arith.constant 0 : index
    %184 = vector.load %arg12[%c0_80, %c0_81] : memref<1x128xf32, #tpu.memory_space<vmem>>, vector<1x128xf32>
    %185 = vector.broadcast %184 : vector<1x128xf32> to vector<8x128xf32>
    %186 = arith.addf %183, %185 : vector<8x128xf32>
    %c0_82 = arith.constant 0 : index
    %c0_83 = arith.constant 0 : index
    %c0_84 = arith.constant 0 : index
    %187 = vector.load %arg13[%c0_82, %c0_83, %c0_84] : memref<1x8x128xf32, #tpu.memory_space<vmem>>, vector<1x8x128xf32>
    %188 = vector.shape_cast %187 : vector<1x8x128xf32> to vector<8x128xf32>
    %189 = vector.shape_cast %186 : vector<8x128xf32> to vector<1x8x128xf32>
    tpu.vector_store %arg13[%c0_82, %c0_83, %c0_84], %189 {strides = array<i32>} : memref<1x8x128xf32, #tpu.memory_space<vmem>>, vector<1x8x128xf32>,
    return
  }
  func.func @transform_0(%arg0: i32, %arg1: i32) -> (i32, i32, i32) {
    %c0_i32 = arith.constant 0 : i32
    %c0_i32_0 = arith.constant 0 : i32
    return %arg0, %arg1, %c0_i32 : i32, i32, i32
  }
  func.func @transform_1(%arg0: i32, %arg1: i32) -> (i32, i32, i32) {
    %c0_i32 = arith.constant 0 : i32
    %c0_i32_0 = arith.constant 0 : i32
    %c0_i32_1 = arith.constant 0 : i32
    return %arg0, %c0_i32, %c0_i32_0 : i32, i32, i32
  }
  func.func @transform_2(%arg0: i32, %arg1: i32) -> (i32, i32, i32) {
    %c0_i32 = arith.constant 0 : i32
    %c0_i32_0 = arith.constant 0 : i32
    %c0_i32_1 = arith.constant 0 : i32
    return %arg0, %c0_i32, %c0_i32_0 : i32, i32, i32
  }
  func.func @transform_3(%arg0: i32, %arg1: i32) -> (i32, i32) {
    %c0_i32 = arith.constant 0 : i32
    %c0_i32_0 = arith.constant 0 : i32
    %c0_i32_1 = arith.constant 0 : i32
    return %c0_i32, %c0_i32_0 : i32, i32
  }
  func.func @transform_4(%arg0: i32, %arg1: i32) -> (i32, i32) {
    %c0_i32 = arith.constant 0 : i32
    %c0_i32_0 = arith.constant 0 : i32
    %c0_i32_1 = arith.constant 0 : i32
    return %c0_i32, %c0_i32_0 : i32, i32
  }
  func.func @transform_5(%arg0: i32, %arg1: i32) -> (i32, i32) {
    %c0_i32 = arith.constant 0 : i32
    %c0_i32_0 = arith.constant 0 : i32
    %c0_i32_1 = arith.constant 0 : i32
    return %c0_i32, %c0_i32_0 : i32, i32
  }
  func.func @transform_6(%arg0: i32, %arg1: i32) -> (i32, i32) {
    %c0_i32 = arith.constant 0 : i32
    %c0_i32_0 = arith.constant 0 : i32
    %c0_i32_1 = arith.constant 0 : i32
    return %c0_i32, %c0_i32_0 : i32, i32
  }
  func.func @transform_7(%arg0: i32, %arg1: i32) -> (i32, i32) {
    %c0_i32 = arith.constant 0 : i32
    %c0_i32_0 = arith.constant 0 : i32
    %c0_i32_1 = arith.constant 0 : i32
    return %c0_i32, %c0_i32_0 : i32, i32
  }
  func.func @transform_8(%arg0: i32, %arg1: i32) -> (i32, i32) {
    %c0_i32 = arith.constant 0 : i32
    %c0_i32_0 = arith.constant 0 : i32
    %c0_i32_1 = arith.constant 0 : i32
    return %c0_i32, %c0_i32_0 : i32, i32
  }
  func.func @transform_9(%arg0: i32, %arg1: i32) -> (i32, i32) {
    %c0_i32 = arith.constant 0 : i32
    %c0_i32_0 = arith.constant 0 : i32
    %c0_i32_1 = arith.constant 0 : i32
    return %c0_i32, %c0_i32_0 : i32, i32
  }
  func.func @transform_10(%arg0: i32, %arg1: i32) -> (i32, i32) {
    %c0_i32 = arith.constant 0 : i32
    %c0_i32_0 = arith.constant 0 : i32
    %c0_i32_1 = arith.constant 0 : i32
    return %c0_i32, %c0_i32_0 : i32, i32
  }
  func.func @transform_11(%arg0: i32, %arg1: i32) -> (i32, i32, i32) {
    %c0_i32 = arith.constant 0 : i32
    %c0_i32_0 = arith.constant 0 : i32
    return %arg0, %arg1, %c0_i32 : i32, i32, i32
  }
}

module attributes {stable_mosaic.version = 11 : i64} {
  func.func @_residual_readout_kernel(%arg0: i32, %arg1: i32, %arg2: memref<1x8x32xf32, #tpu.memory_space<vmem>>, %arg3: memref<1x1x32xf32, #tpu.memory_space<vmem>>, %arg4: memref<1x1x32xf32, #tpu.memory_space<vmem>>, %arg5: memref<32x64xbf16, #tpu.memory_space<vmem>>, %arg6: memref<1x64xf32, #tpu.memory_space<vmem>>, %arg7: memref<64x32xbf16, #tpu.memory_space<vmem>>, %arg8: memref<1x32xf32, #tpu.memory_space<vmem>>, %arg9: memref<1x32xf32, #tpu.memory_space<vmem>>, %arg10: memref<1x32xf32, #tpu.memory_space<vmem>>, %arg11: memref<32x128xbf16, #tpu.memory_space<vmem>>, %arg12: memref<1x128xf32, #tpu.memory_space<vmem>>, %arg13: memref<1x8x128xf32, #tpu.memory_space<vmem>>) attributes {dimension_semantics = [#tpu.dimension_semantics<parallel>, #tpu.dimension_semantics<parallel>], iteration_bounds = array<i64: 2, 3>, scalar_prefetch = 0 : i64, scratch_operands = 0 : i64, tpu.core_type = #tpu.core_type<tc>, window_params = [{transform_indices = @transform_0, window_bounds = array<i64: 1, 8, 32>}, {transform_indices = @transform_1, window_bounds = array<i64: 1, 1, 32>}, {transform_indices = @transform_2, window_bounds = array<i64: 1, 1, 32>}, {pipeline_mode = #tpu.pipeline_mode<synchronous>, transform_indices = @transform_3, window_bounds = array<i64: 32, 64>}, {pipeline_mode = #tpu.pipeline_mode<synchronous>, transform_indices = @transform_4, window_bounds = array<i64: 1, 64>}, {pipeline_mode = #tpu.pipeline_mode<synchronous>, transform_indices = @transform_5, window_bounds = array<i64: 64, 32>}, {pipeline_mode = #tpu.pipeline_mode<synchronous>, transform_indices = @transform_6, window_bounds = array<i64: 1, 32>}, {pipeline_mode = #tpu.pipeline_mode<synchronous>, transform_indices = @transform_7, window_bounds = array<i64: 1, 32>}, {pipeline_mode = #tpu.pipeline_mode<synchronous>, transform_indices = @transform_8, window_bounds = array<i64: 1, 32>}, {pipeline_mode = #tpu.pipeline_mode<synchronous>, transform_indices = @transform_9, window_bounds = array<i64: 32, 128>}, {pipeline_mode = #tpu.pipeline_mode<synchronous>, transform_indices = @transform_10, window_bounds = array<i64: 1, 128>}, {transform_indices = @transform_11, window_bounds = array<i64: 1, 8, 128>}]} {
    %c0 = arith.constant 0 : index
    %c0_0 = arith.constant 0 : index
    %c0_1 = arith.constant 0 : index
    %0 = vector.load %arg2[%c0, %c0_0, %c0_1] : memref<1x8x32xf32, #tpu.memory_space<vmem>>, vector<1x8x32xf32>
    %1 = vector.shape_cast %0 : vector<1x8x32xf32> to vector<8x32xf32>
    %c0_2 = arith.constant 0 : index
    %c0_3 = arith.constant 0 : index
    %c0_4 = arith.constant 0 : index
    %2 = vector.load %arg3[%c0_2, %c0_3, %c0_4] : memref<1x1x32xf32, #tpu.memory_space<vmem>>, vector<1x1x32xf32>
    %3 = vector.shape_cast %2 : vector<1x1x32xf32> to vector<1x32xf32>
    %c0_5 = arith.constant 0 : index
    %c0_6 = arith.constant 0 : index
    %c0_7 = arith.constant 0 : index
    %4 = vector.load %arg4[%c0_5, %c0_6, %c0_7] : memref<1x1x32xf32, #tpu.memory_space<vmem>>, vector<1x1x32xf32>
    %5 = vector.shape_cast %4 : vector<1x1x32xf32> to vector<1x32xf32>
    %c0_8 = arith.constant 0 : index
    %c0_9 = arith.constant 0 : index
    %6 = vector.load %arg9[%c0_8, %c0_9] : memref<1x32xf32, #tpu.memory_space<vmem>>, vector<1x32xf32>
    %7 = arith.mulf %3, %6 : vector<1x32xf32>
    %c0_10 = arith.constant 0 : index
    %c0_11 = arith.constant 0 : index
    %8 = vector.load %arg10[%c0_10, %c0_11] : memref<1x32xf32, #tpu.memory_space<vmem>>, vector<1x32xf32>
    %9 = arith.mulf %3, %8 : vector<1x32xf32>
    %10 = arith.addf %9, %5 : vector<1x32xf32>
    %c0_i32 = arith.constant 0 : i32
    %11 = arith.truncf %1 : vector<8x32xf32> to vector<8x32xbf16>
    %c0_12 = arith.constant 0 : index
    %c0_13 = arith.constant 0 : index
    %12 = vector.load %arg5[%c0_12, %c0_13] : memref<32x64xbf16, #tpu.memory_space<vmem>>, vector<32x64xbf16>
    %cst = arith.constant dense<0.000000e+00> : vector<8x64xf32>
    %13 = tpu.matmul %11, %12, %cst {dimension_numbers = #tpu.dot_dimension_numbers<[1], [0], [0], [1], [0, 0, 1, 1], [], []>} : vector<8x32xbf16>, vector<32x64xbf16>, vector<8x64xf32> -> vector<8x64xf32>
    %c0_14 = arith.constant 0 : index
    %c0_15 = arith.constant 0 : index
    %14 = vector.load %arg6[%c0_14, %c0_15] : memref<1x64xf32, #tpu.memory_space<vmem>>, vector<1x64xf32>
    %15 = vector.broadcast %14 : vector<1x64xf32> to vector<8x64xf32>
    %16 = arith.addf %13, %15 : vector<8x64xf32>
    %cst_16 = arith.constant 5.000000e-01 : f32
    %17 = vector.broadcast %cst_16 : f32 to vector<8x64xf32>
    %18 = arith.mulf %17, %16 : vector<8x64xf32>
    %cst_17 = arith.constant 0.707106769 : f32
    %19 = vector.broadcast %cst_17 : f32 to vector<8x64xf32>
    %20 = arith.mulf %16, %19 : vector<8x64xf32>
    %cst_18 = arith.constant -4.000000e+00 : f32
    %cst_19 = arith.constant 4.000000e+00 : f32
    %21 = vector.broadcast %cst_18 : f32 to vector<8x64xf32>
    %22 = arith.maximumf %21, %20 : vector<8x64xf32>
    %23 = vector.broadcast %cst_19 : f32 to vector<8x64xf32>
    %24 = arith.minimumf %23, %22 : vector<8x64xf32>
    %25 = arith.mulf %24, %24 : vector<8x64xf32>
    %cst_20 = arith.constant -2.72614237E-10 : f32
    %26 = vector.broadcast %cst_20 : f32 to vector<8x64xf32>
    %27 = arith.mulf %26, %25 : vector<8x64xf32>
    %cst_21 = arith.constant 2.77068146E-8 : f32
    %28 = vector.broadcast %cst_21 : f32 to vector<8x64xf32>
    %29 = arith.addf %27, %28 : vector<8x64xf32>
    %30 = arith.mulf %29, %25 : vector<8x64xf32>
    %cst_22 = arith.constant -2.10102394E-6 : f32
    %31 = vector.broadcast %cst_22 : f32 to vector<8x64xf32>
    %32 = arith.addf %30, %31 : vector<8x64xf32>
    %33 = arith.mulf %32, %25 : vector<8x64xf32>
    %cst_23 = arith.constant -5.69250624E-5 : f32
    %34 = vector.broadcast %cst_23 : f32 to vector<8x64xf32>
    %35 = arith.addf %33, %34 : vector<8x64xf32>
    %36 = arith.mulf %35, %25 : vector<8x64xf32>
    %cst_24 = arith.constant -7.34990637E-4 : f32
    %37 = vector.broadcast %cst_24 : f32 to vector<8x64xf32>
    %38 = arith.addf %36, %37 : vector<8x64xf32>
    %39 = arith.mulf %38, %25 : vector<8x64xf32>
    %cst_25 = arith.constant -0.00295460015 : f32
    %40 = vector.broadcast %cst_25 : f32 to vector<8x64xf32>
    %41 = arith.addf %39, %40 : vector<8x64xf32>
    %42 = arith.mulf %41, %25 : vector<8x64xf32>
    %cst_26 = arith.constant -0.0160960332 : f32
    %43 = vector.broadcast %cst_26 : f32 to vector<8x64xf32>
    %44 = arith.addf %42, %43 : vector<8x64xf32>
    %cst_27 = arith.constant -1.45660715E-5 : f32
    %45 = vector.broadcast %cst_27 : f32 to vector<8x64xf32>
    %46 = arith.mulf %45, %25 : vector<8x64xf32>
    %cst_28 = arith.constant -2.13374049E-4 : f32
    %47 = vector.broadcast %cst_28 : f32 to vector<8x64xf32>
    %48 = arith.addf %46, %47 : vector<8x64xf32>
    %49 = arith.mulf %48, %25 : vector<8x64xf32>
    %cst_29 = arith.constant -0.00168282702 : f32
    %50 = vector.broadcast %cst_29 : f32 to vector<8x64xf32>
    %51 = arith.addf %49, %50 : vector<8x64xf32>
    %52 = arith.mulf %51, %25 : vector<8x64xf32>
    %cst_30 = arith.constant -0.00737332925 : f32
    %53 = vector.broadcast %cst_30 : f32 to vector<8x64xf32>
    %54 = arith.addf %52, %53 : vector<8x64xf32>
    %55 = arith.mulf %54, %25 : vector<8x64xf32>
    %cst_31 = arith.constant -0.0142647391 : f32
    %56 = vector.broadcast %cst_31 : f32 to vector<8x64xf32>
    %57 = arith.addf %55, %56 : vector<8x64xf32>
    %58 = arith.mulf %24, %44 : vector<8x64xf32>
    %59 = tpu.reciprocal %57 {approx = true} : vector<8x64xf32> -> vector<8x64xf32>
    %60 = arith.mulf %58, %59 : vector<8x64xf32>
    %cst_32 = arith.constant 1.000000e+00 : f32
    %61 = vector.broadcast %cst_32 : f32 to vector<8x64xf32>
    %62 = arith.addf %61, %60 : vector<8x64xf32>
    %63 = arith.mulf %18, %62 : vector<8x64xf32>
    %64 = arith.truncf %63 : vector<8x64xf32> to vector<8x64xbf16>
    %c0_33 = arith.constant 0 : index
    %c0_34 = arith.constant 0 : index
    %65 = vector.load %arg7[%c0_33, %c0_34] : memref<64x32xbf16, #tpu.memory_space<vmem>>, vector<64x32xbf16>
    %cst_35 = arith.constant dense<0.000000e+00> : vector<8x32xf32>
    %66 = tpu.matmul %64, %65, %cst_35 {dimension_numbers = #tpu.dot_dimension_numbers<[1], [0], [0], [1], [0, 0, 1, 1], [], []>} : vector<8x64xbf16>, vector<64x32xbf16>, vector<8x32xf32> -> vector<8x32xf32>
    %c0_36 = arith.constant 0 : index
    %c0_37 = arith.constant 0 : index
    %67 = vector.load %arg8[%c0_36, %c0_37] : memref<1x32xf32, #tpu.memory_space<vmem>>, vector<1x32xf32>
    %68 = vector.broadcast %67 : vector<1x32xf32> to vector<8x32xf32>
    %69 = arith.addf %66, %68 : vector<8x32xf32>
    %70 = arith.addf %1, %69 : vector<8x32xf32>
    %cst_38 = arith.constant dense<0.000000e+00> : vector<8xf32>
    %71 = vector.multi_reduction <add>, %70, %cst_38 [1] : vector<8x32xf32> to vector<8xf32>
    %72 = vector.shape_cast %71 : vector<8xf32> to vector<8x1xf32>
    %73 = arith.mulf %70, %70 : vector<8x32xf32>
    %cst_39 = arith.constant dense<0.000000e+00> : vector<8xf32>
    %74 = vector.multi_reduction <add>, %73, %cst_39 [1] : vector<8x32xf32> to vector<8xf32>
    %75 = vector.shape_cast %74 : vector<8xf32> to vector<8x1xf32>
    %cst_40 = arith.constant 3.125000e-02 : f32
    %76 = vector.broadcast %cst_40 : f32 to vector<8x1xf32>
    %77 = arith.mulf %72, %76 : vector<8x1xf32>
    %cst_41 = arith.constant 3.125000e-02 : f32
    %78 = vector.broadcast %cst_41 : f32 to vector<8x1xf32>
    %79 = arith.mulf %75, %78 : vector<8x1xf32>
    %80 = arith.mulf %77, %77 : vector<8x1xf32>
    %81 = arith.subf %79, %80 : vector<8x1xf32>
    %cst_42 = arith.constant 0.000000e+00 : f32
    %82 = vector.broadcast %cst_42 : f32 to vector<8x1xf32>
    %83 = arith.maximumf %81, %82 : vector<8x1xf32>
    %cst_43 = arith.constant 9.99999974E-6 : f32
    %84 = vector.broadcast %cst_43 : f32 to vector<8x1xf32>
    %85 = arith.addf %83, %84 : vector<8x1xf32>
    %86 = math.rsqrt %85 : vector<8x1xf32>
    %87 = vector.broadcast %7 : vector<1x32xf32> to vector<8x32xf32>
    %88 = vector.broadcast %86 : vector<8x1xf32> to vector<8x32xf32>
    %89 = arith.mulf %87, %88 : vector<8x32xf32>
    %90 = arith.mulf %70, %89 : vector<8x32xf32>
    %91 = vector.broadcast %77 : vector<8x1xf32> to vector<8x32xf32>
    %92 = arith.mulf %91, %89 : vector<8x32xf32>
    %93 = vector.broadcast %10 : vector<1x32xf32> to vector<8x32xf32>
    %94 = arith.subf %93, %92 : vector<8x32xf32>
    %95 = arith.addf %90, %94 : vector<8x32xf32>
    %c1_i32 = arith.constant 1 : i32
    %96 = arith.truncf %95 : vector<8x32xf32> to vector<8x32xbf16>
    %c0_44 = arith.constant 0 : index
    %c0_45 = arith.constant 0 : index
    %97 = vector.load %arg5[%c0_44, %c0_45] : memref<32x64xbf16, #tpu.memory_space<vmem>>, vector<32x64xbf16>
    %cst_46 = arith.constant dense<0.000000e+00> : vector<8x64xf32>
    %98 = tpu.matmul %96, %97, %cst_46 {dimension_numbers = #tpu.dot_dimension_numbers<[1], [0], [0], [1], [0, 0, 1, 1], [], []>} : vector<8x32xbf16>, vector<32x64xbf16>, vector<8x64xf32> -> vector<8x64xf32>
    %c0_47 = arith.constant 0 : index
    %c0_48 = arith.constant 0 : index
    %99 = vector.load %arg6[%c0_47, %c0_48] : memref<1x64xf32, #tpu.memory_space<vmem>>, vector<1x64xf32>
    %100 = vector.broadcast %99 : vector<1x64xf32> to vector<8x64xf32>
    %101 = arith.addf %98, %100 : vector<8x64xf32>
    %cst_49 = arith.constant 5.000000e-01 : f32
    %102 = vector.broadcast %cst_49 : f32 to vector<8x64xf32>
    %103 = arith.mulf %102, %101 : vector<8x64xf32>
    %cst_50 = arith.constant 0.707106769 : f32
    %104 = vector.broadcast %cst_50 : f32 to vector<8x64xf32>
    %105 = arith.mulf %101, %104 : vector<8x64xf32>
    %cst_51 = arith.constant -4.000000e+00 : f32
    %cst_52 = arith.constant 4.000000e+00 : f32
    %106 = vector.broadcast %cst_51 : f32 to vector<8x64xf32>
    %107 = arith.maximumf %106, %105 : vector<8x64xf32>
    %108 = vector.broadcast %cst_52 : f32 to vector<8x64xf32>
    %109 = arith.minimumf %108, %107 : vector<8x64xf32>
    %110 = arith.mulf %109, %109 : vector<8x64xf32>
    %cst_53 = arith.constant -2.72614237E-10 : f32
    %111 = vector.broadcast %cst_53 : f32 to vector<8x64xf32>
    %112 = arith.mulf %111, %110 : vector<8x64xf32>
    %cst_54 = arith.constant 2.77068146E-8 : f32
    %113 = vector.broadcast %cst_54 : f32 to vector<8x64xf32>
    %114 = arith.addf %112, %113 : vector<8x64xf32>
    %115 = arith.mulf %114, %110 : vector<8x64xf32>
    %cst_55 = arith.constant -2.10102394E-6 : f32
    %116 = vector.broadcast %cst_55 : f32 to vector<8x64xf32>
    %117 = arith.addf %115, %116 : vector<8x64xf32>
    %118 = arith.mulf %117, %110 : vector<8x64xf32>
    %cst_56 = arith.constant -5.69250624E-5 : f32
    %119 = vector.broadcast %cst_56 : f32 to vector<8x64xf32>
    %120 = arith.addf %118, %119 : vector<8x64xf32>
    %121 = arith.mulf %120, %110 : vector<8x64xf32>
    %cst_57 = arith.constant -7.34990637E-4 : f32
    %122 = vector.broadcast %cst_57 : f32 to vector<8x64xf32>
    %123 = arith.addf %121, %122 : vector<8x64xf32>
    %124 = arith.mulf %123, %110 : vector<8x64xf32>
    %cst_58 = arith.constant -0.00295460015 : f32
    %125 = vector.broadcast %cst_58 : f32 to vector<8x64xf32>
    %126 = arith.addf %124, %125 : vector<8x64xf32>
    %127 = arith.mulf %126, %110 : vector<8x64xf32>
    %cst_59 = arith.constant -0.0160960332 : f32
    %128 = vector.broadcast %cst_59 : f32 to vector<8x64xf32>
    %129 = arith.addf %127, %128 : vector<8x64xf32>
    %cst_60 = arith.constant -1.45660715E-5 : f32
    %130 = vector.broadcast %cst_60 : f32 to vector<8x64xf32>
    %131 = arith.mulf %130, %110 : vector<8x64xf32>
    %cst_61 = arith.constant -2.13374049E-4 : f32
    %132 = vector.broadcast %cst_61 : f32 to vector<8x64xf32>
    %133 = arith.addf %131, %132 : vector<8x64xf32>
    %134 = arith.mulf %133, %110 : vector<8x64xf32>
    %cst_62 = arith.constant -0.00168282702 : f32
    %135 = vector.broadcast %cst_62 : f32 to vector<8x64xf32>
    %136 = arith.addf %134, %135 : vector<8x64xf32>
    %137 = arith.mulf %136, %110 : vector<8x64xf32>
    %cst_63 = arith.constant -0.00737332925 : f32
    %138 = vector.broadcast %cst_63 : f32 to vector<8x64xf32>
    %139 = arith.addf %137, %138 : vector<8x64xf32>
    %140 = arith.mulf %139, %110 : vector<8x64xf32>
    %cst_64 = arith.constant -0.0142647391 : f32
    %141 = vector.broadcast %cst_64 : f32 to vector<8x64xf32>
    %142 = arith.addf %140, %141 : vector<8x64xf32>
    %143 = arith.mulf %109, %129 : vector<8x64xf32>
    %144 = tpu.reciprocal %142 {approx = true} : vector<8x64xf32> -> vector<8x64xf32>
    %145 = arith.mulf %143, %144 : vector<8x64xf32>
    %cst_65 = arith.constant 1.000000e+00 : f32
    %146 = vector.broadcast %cst_65 : f32 to vector<8x64xf32>
    %147 = arith.addf %146, %145 : vector<8x64xf32>
    %148 = arith.mulf %103, %147 : vector<8x64xf32>
    %149 = arith.truncf %148 : vector<8x64xf32> to vector<8x64xbf16>
    %c0_66 = arith.constant 0 : index
    %c0_67 = arith.constant 0 : index
    %150 = vector.load %arg7[%c0_66, %c0_67] : memref<64x32xbf16, #tpu.memory_space<vmem>>, vector<64x32xbf16>
    %cst_68 = arith.constant dense<0.000000e+00> : vector<8x32xf32>
    %151 = tpu.matmul %149, %150, %cst_68 {dimension_numbers = #tpu.dot_dimension_numbers<[1], [0], [0], [1], [0, 0, 1, 1], [], []>} : vector<8x64xbf16>, vector<64x32xbf16>, vector<8x32xf32> -> vector<8x32xf32>
    %c0_69 = arith.constant 0 : index
    %c0_70 = arith.constant 0 : index
    %152 = vector.load %arg8[%c0_69, %c0_70] : memref<1x32xf32, #tpu.memory_space<vmem>>, vector<1x32xf32>
    %153 = vector.broadcast %152 : vector<1x32xf32> to vector<8x32xf32>
    %154 = arith.addf %151, %153 : vector<8x32xf32>
    %155 = arith.addf %95, %154 : vector<8x32xf32>
    %cst_71 = arith.constant dense<0.000000e+00> : vector<8xf32>
    %156 = vector.multi_reduction <add>, %155, %cst_71 [1] : vector<8x32xf32> to vector<8xf32>
    %157 = vector.shape_cast %156 : vector<8xf32> to vector<8x1xf32>
    %158 = arith.mulf %155, %155 : vector<8x32xf32>
    %cst_72 = arith.constant dense<0.000000e+00> : vector<8xf32>
    %159 = vector.multi_reduction <add>, %158, %cst_72 [1] : vector<8x32xf32> to vector<8xf32>
    %160 = vector.shape_cast %159 : vector<8xf32> to vector<8x1xf32>
    %cst_73 = arith.constant 3.125000e-02 : f32
    %161 = vector.broadcast %cst_73 : f32 to vector<8x1xf32>
    %162 = arith.mulf %157, %161 : vector<8x1xf32>
    %cst_74 = arith.constant 3.125000e-02 : f32
    %163 = vector.broadcast %cst_74 : f32 to vector<8x1xf32>
    %164 = arith.mulf %160, %163 : vector<8x1xf32>
    %165 = arith.mulf %162, %162 : vector<8x1xf32>
    %166 = arith.subf %164, %165 : vector<8x1xf32>
    %cst_75 = arith.constant 0.000000e+00 : f32
    %167 = vector.broadcast %cst_75 : f32 to vector<8x1xf32>
    %168 = arith.maximumf %166, %167 : vector<8x1xf32>
    %cst_76 = arith.constant 9.99999974E-6 : f32
    %169 = vector.broadcast %cst_76 : f32 to vector<8x1xf32>
    %170 = arith.addf %168, %169 : vector<8x1xf32>
    %171 = math.rsqrt %170 : vector<8x1xf32>
    %172 = vector.broadcast %7 : vector<1x32xf32> to vector<8x32xf32>
    %173 = vector.broadcast %171 : vector<8x1xf32> to vector<8x32xf32>
    %174 = arith.mulf %172, %173 : vector<8x32xf32>
    %175 = arith.mulf %155, %174 : vector<8x32xf32>
    %176 = vector.broadcast %162 : vector<8x1xf32> to vector<8x32xf32>
    %177 = arith.mulf %176, %174 : vector<8x32xf32>
    %178 = vector.broadcast %10 : vector<1x32xf32> to vector<8x32xf32>
    %179 = arith.subf %178, %177 : vector<8x32xf32>
    %180 = arith.addf %175, %179 : vector<8x32xf32>
    %181 = arith.truncf %180 : vector<8x32xf32> to vector<8x32xbf16>
    %c0_77 = arith.constant 0 : index
    %c0_78 = arith.constant 0 : index
    %182 = vector.load %arg11[%c0_77, %c0_78] : memref<32x128xbf16, #tpu.memory_space<vmem>>, vector<32x128xbf16>
    %cst_79 = arith.constant dense<0.000000e+00> : vector<8x128xf32>
    %183 = tpu.matmul %181, %182, %cst_79 {dimension_numbers = #tpu.dot_dimension_numbers<[1], [0], [0], [1], [0, 0, 1, 1], [], []>} : vector<8x32xbf16>, vector<32x128xbf16>, vector<8x128xf32> -> vector<8x128xf32>
    %c0_80 = arith.constant 0 : index
    %c0_81 = arith.constant 0 : index
    %184 = vector.load %arg12[%c0_80, %c0_81] : memref<1x128xf32, #tpu.memory_space<vmem>>, vector<1x128xf32>
    %185 = vector.broadcast %184 : vector<1x128xf32> to vector<8x128xf32>
    %186 = arith.addf %183, %185 : vector<8x128xf32>
    %c0_82 = arith.constant 0 : index
    %c0_83 = arith.constant 0 : index
    %c0_84 = arith.constant 0 : index
    %187 = vector.load %arg13[%c0_82, %c0_83, %c0_84] : memref<1x8x128xf32, #tpu.memory_space<vmem>>, vector<1x8x128xf32>
    %188 = vector.shape_cast %187 : vector<1x8x128xf32> to vector<8x128xf32>
    %189 = vector.shape_cast %186 : vector<8x128xf32> to vector<1x8x128xf32>
    tpu.vector_store %arg13[%c0_82, %c0_83, %c0_84], %189 {strides = array<i32>} : memref<1x8x128xf32, #tpu.memory_space<vmem>>, vector<1x8x128xf32>,
    return
  }
  func.func @transform_0(%arg0: i32, %arg1: i32) -> (i32, i32, i32) {
    %c0_i32 = arith.constant 0 : i32
    %c0_i32_0 = arith.constant 0 : i32
    return %arg0, %arg1, %c0_i32 : i32, i32, i32
  }
  func.func @transform_1(%arg0: i32, %arg1: i32) -> (i32, i32, i32) {
    %c0_i32 = arith.constant 0 : i32
    %c0_i32_0 = arith.constant 0 : i32
    %c0_i32_1 = arith.constant 0 : i32
    return %arg0, %c0_i32, %c0_i32_0 : i32, i32, i32
  }
  func.func @transform_2(%arg0: i32, %arg1: i32) -> (i32, i32, i32) {
    %c0_i32 = arith.constant 0 : i32
    %c0_i32_0 = arith.constant 0 : i32
    %c0_i32_1 = arith.constant 0 : i32
    return %arg0, %c0_i32, %c0_i32_0 : i32, i32, i32
  }
  func.func @transform_3(%arg0: i32, %arg1: i32) -> (i32, i32) {
    %c0_i32 = arith.constant 0 : i32
    %c0_i32_0 = arith.constant 0 : i32
    %c0_i32_1 = arith.constant 0 : i32
    return %c0_i32, %c0_i32_0 : i32, i32
  }
  func.func @transform_4(%arg0: i32, %arg1: i32) -> (i32, i32) {
    %c0_i32 = arith.constant 0 : i32
    %c0_i32_0 = arith.constant 0 : i32
    %c0_i32_1 = arith.constant 0 : i32
    return %c0_i32, %c0_i32_0 : i32, i32
  }
  func.func @transform_5(%arg0: i32, %arg1: i32) -> (i32, i32) {
    %c0_i32 = arith.constant 0 : i32
    %c0_i32_0 = arith.constant 0 : i32
    %c0_i32_1 = arith.constant 0 : i32
    return %c0_i32, %c0_i32_0 : i32, i32
  }
  func.func @transform_6(%arg0: i32, %arg1: i32) -> (i32, i32) {
    %c0_i32 = arith.constant 0 : i32
    %c0_i32_0 = arith.constant 0 : i32
    %c0_i32_1 = arith.constant 0 : i32
    return %c0_i32, %c0_i32_0 : i32, i32
  }
  func.func @transform_7(%arg0: i32, %arg1: i32) -> (i32, i32) {
    %c0_i32 = arith.constant 0 : i32
    %c0_i32_0 = arith.constant 0 : i32
    %c0_i32_1 = arith.constant 0 : i32
    return %c0_i32, %c0_i32_0 : i32, i32
  }
  func.func @transform_8(%arg0: i32, %arg1: i32) -> (i32, i32) {
    %c0_i32 = arith.constant 0 : i32
    %c0_i32_0 = arith.constant 0 : i32
    %c0_i32_1 = arith.constant 0 : i32
    return %c0_i32, %c0_i32_0 : i32, i32
  }
  func.func @transform_9(%arg0: i32, %arg1: i32) -> (i32, i32) {
    %c0_i32 = arith.constant 0 : i32
    %c0_i32_0 = arith.constant 0 : i32
    %c0_i32_1 = arith.constant 0 : i32
    return %c0_i32, %c0_i32_0 : i32, i32
  }
  func.func @transform_10(%arg0: i32, %arg1: i32) -> (i32, i32) {
    %c0_i32 = arith.constant 0 : i32
    %c0_i32_0 = arith.constant 0 : i32
    %c0_i32_1 = arith.constant 0 : i32
    return %c0_i32, %c0_i32_0 : i32, i32
  }
  func.func @transform_11(%arg0: i32, %arg1: i32) -> (i32, i32, i32) {
    %c0_i32 = arith.constant 0 : i32
    %c0_i32_0 = arith.constant 0 : i32
    return %arg0, %arg1, %c0_i32 : i32, i32, i32
  }
}

</mosaic_0001>

<bundles_post_ra>
// kernel: tpu_custom_call.1
= control target key start
LH: loop header
LB: loop body
LE: loop exit
PB: predicated region body
PF: predicated region fallthrough
CT: control target
= control target key end

     0   :  { %s2272_s0 = inlined_call_operand.vmem [shape: f32[2,24,32], index: 0, kind: input, shape index: {}]   ;;  %s2273_s1 = inlined_call_operand.vmem [shape: f32[2,1,32], index: 1, kind: input, shape index: {}]   ;;  %s2274_s2 = inlined_call_operand.hbm [shape: f32[2,1,32], index: 2, kind: input, shape index: {}]   ;;  %s2275_s3 = inlined_call_operand.hbm [shape: bf16[32,64], index: 3, kind: input, shape index: {}]   ;;  %s2276_s4 = inlined_call_operand.hbm [shape: f32[1,64], index: 4, kind: input, shape index: {}]   ;;  %s2277_s5 = inlined_call_operand.vmem [shape: bf16[64,32], index: 5, kind: input, shape index: {}]   ;;  %s2278_s6 = inlined_call_operand.hbm [shape: f32[1,32], index: 6, kind: input, shape index: {}]   ;;  %s2279_s7 = inlined_call_operand.hbm [shape: f32[1,32], index: 7, kind: input, shape index: {}]   ;;  %s2280_s8 = inlined_call_operand.hbm [shape: f32[1,32], index: 8, kind: input, shape index: {}]   ;;  %s2281_s9 = inlined_call_operand.vmem [shape: bf16[32,128], index: 9, kind: input, shape index: {}]   ;;  %s2282_s10 = inlined_call_operand.vmem [shape: f32[1,128], index: 10, kind: input, shape index: {}]   ;;  %s2283_s11 = inlined_call_operand.hbm [shape: f32[2,24,128], index: 11, kind: output, shape index: {}]  }
   0x1   :  { %2298 = sst [smem:[#allocation23_spill]] %s2272_s0 }
   0x2   :  { %2299 = sst [smem:[#allocation24_spill]] %s2273_s1 }
   0x3   :  { %2300 = sst [smem:[#allocation25_spill]] %s2274_s2 }
   0x4   :  { %2301 = sst [smem:[#allocation26_spill]] %s2275_s3 }
   0x5   :  { %2302 = sst [smem:[#allocation27_spill]] %s2276_s4 }
   0x6   :  { %2303 = sst [smem:[#allocation28_spill]] %s2277_s5 }
   0x7   :  { %2304 = sst [smem:[#allocation29_spill]] %s2278_s6 }
   0x8   :  { %2305 = sst [smem:[#allocation30_spill]] %s2279_s7 }
   0x9   :  { %2306 = sst [smem:[#allocation31_spill]] %s2280_s8 }
   0xa   :  { %2307 = sst [smem:[#allocation32_spill]] %s2281_s9 }
   0xb   :  { %2308 = sst [smem:[#allocation33_spill]] %s2282_s10 }
   0xc   :  { %2309 = sst [smem:[#allocation34_spill]] %s2283_s11 }
   0xd   :  { %16 = vsyncpa [#allocation3], 0 }
   0xe   :  { %18 = vsyncpa [#allocation3 + $0x1], 0 }
   0xf   :  { %19 = vsyncpa [#allocation6], 0 }
  0x10   :  { %20 = vsyncpa [#allocation9], 0 }
  0x11   :  { %21 = vsyncpa [#allocation12], 0 }
  0x12   :  { %22 = vsyncpa [#allocation4], 0 }
  0x13   :  { %24 = vsyncpa [#allocation4 + $0x1], 0  ;;  %s1782_s17 = smov 0   ;;  %s1784_s18 = smov 0  }
  0x14   :  { %s1786_s19 = smov 0   ;;  %s1788_s20 = smov 0  }
  0x15   :  { %s1790_s21 = smov 0   ;;  %s1792_s22 = smov 0  }
  0x16   :  { %s1794_s23 = smov 0   ;;  %s1796_s24 = smov 0  }
  0x17   :  { %s1798_s25 = smov 0   ;;  %s1800_s26 = smov 0  }
  0x18   :  { %s1802_s27 = smov 0  }
  0x19 LB: > { %2310 = sst [smem:[#allocation19_spill]] %s1693_s23  ;;  %s1123_s28 = sadd.s32 4294967295, %s1709_s27   ;;  %s1709_s27 = sphi %s1802_s27, %s30_s27   ;;  %s1705_s26 = sphi %s1800_s26, %s2357_s26   ;;  %s1701_s25 = sphi %s1798_s25, %s2356_s25   ;;  %s1697_s24 = sphi %s1796_s24, %s2355_s24   ;;  %s1693_s23 = sphi %s1794_s23, %s2354_s23   ;;  %s1689_s22 = sphi %s1792_s22, %s2353_s22   ;;  %s1685_s21 = sphi %s1790_s21, %s2352_s21   ;;  %s1681_s20 = sphi %s1788_s20, %s2351_s20   ;;  %s1677_s19 = sphi %s1786_s19, %s2350_s19   ;;  %s1673_s18 = sphi %s1784_s18, %s2349_s18   ;;  %s1669_s17 = sphi %s1782_s17, %s2348_s17  }
  0x1a   : > { %2311 = sst [smem:[#allocation20_spill]] %s1697_s24  ;;  %p1125_p0 = scmp.ge.s32.totalorder %s1709_s27, 1 }
  0x1b   : > { %p1839_p1 = scmp.eq.s32.totalorder %s1123_s28, 0  ;;  %p1843_p2 = scmp.eq.s32.totalorder %s1123_s28, 5 }
  0x1c   : > { %p323_p3 = scmp.lt.s32.totalorder %s1709_s27, 7  ;;  %s1711_s13 = smov [#allocation5]  }
  0x1d   : > { %s2312_s29 = scalar_select %p1839_p1, 1, 0 }
  0x1e   : > { %s2313_s30 = scalar_select %p1843_p2, 1, 0 }
  0x1f   : > { %p1848_p4 = pnand %p1125_p0, %p323_p3  ;;  %s335_s14 = sshll.u32 %s1711_s13, 4  ;;  %s1852_s14 = int_to_ptr.vmem [resolvable:$true] %s335_s14 }
  0x20   : > { %2314 = sst [smem:[#allocation21_spill]] %s2313_s30  ;;  %s1712_s16 = smov [#allocation8]  }
  0x21   : > { %s2315_s12 = scalar_select %p1848_p4, 1, 0 }
  0x22   : > { %p1256_p5 = pneg %p1848_p4  ;;  %s363_s28 = sshll.u32 %s1712_s16, 4  ;;  %s1862_s28 = int_to_ptr.vmem [resolvable:$true] %s363_s28 }
  0x23   : > { %2316 = sst [smem:[#allocation22_spill]] %s2315_s12  ;;  %s1713_s11 = smov [#allocation7]  }
  0x24   : > { %p1858_p6 = pnand %p1256_p5, %p1839_p1  ;;  %s349_s10 = sshll.u32 %s1713_s11, 4  ;;  %s1864_s10 = int_to_ptr.vmem [resolvable:$true] %s349_s10 }
  0x25   : > { %s2318_s3 = sld [smem:[#allocation26_spill]] }
  0x26   : > { %p1874_p8 = pneg %p1858_p6 }
  0x2b   : > { %s1405_s1 = scalar_lea.hbm %s2318_s3, 256 }
  0x2c   : > { %p1406_p7 = scmp.ne.s32.totalorder %s2318_s3, %s1405_s1  ;;  %p1412_p11 = scmp.lt.u32.totalorder %s1405_s1, %s2318_s3 }
  0x2e   : > { %p1408_p9 = pnand %p1874_p8, %p1406_p7 }
  0x30   : > { %p1409_p10 = pneg %p1408_p9 }
  0x32   : > { %p1414_p12 = pnand %p1412_p11, %p1409_p10 }
  0x34   : > { %1417 = shalt.err (!%p1414_p12)
}
  0x35   : > { %s1418_s0 = scalar_lea.vmem %s1852_s14, 256  ;;  %p1426_p5 = scmp.lt.s32.totalorder %s1852_s14, %s1852_s14 }
  0x36   : > { %p1419_p13 = scmp.ne.s32.totalorder %s1852_s14, %s1418_s0  ;;  %p1427_p4 = scmp.lt.s32.totalorder %s1418_s0, %s1418_s0 }
  0x38   : > { %p1421_p0 = pnand %p1419_p13, %p1874_p8  ;;  %p1428_p7 = por %p1427_p4, %p1426_p5 }
  0x3a   : > { %p1422_p3 = pneg %p1421_p0 }
  0x3c   : > { %p1429_p9 = pnand %p1428_p7, %p1422_p3 }
  0x3e   : > { %1432 = shalt.err (!%p1429_p9)
}
  0x3f   : > { %s1714_s5 = smov 64   ;;  %s1715_s1 = smov 4  }
  0x40   : > { %1259 = dma.hbm_to_vmem [thread:$0]  (!%p1858_p6), %s2318_s3, 256, %s1852_s14, [#allocation6], %s1714_s5, %s1714_s5, %s1715_s1  }
  0x41   : > { %s2320_s6 = sld [smem:[#allocation29_spill]] }
  0x47   : > { %s1433_s24 = scalar_lea.hbm %s2320_s6, 16 }
  0x48   : > { %p1434_p4 = scmp.ne.s32.totalorder %s2320_s6, %s1433_s24  ;;  %p1440_p12 = scmp.lt.u32.totalorder %s1433_s24, %s2320_s6 }
  0x4a   : > { %p1436_p10 = pnand %p1434_p4, %p1874_p8 }
  0x4c   : > { %p1437_p11 = pneg %p1436_p10 }
  0x4e   : > { %p1442_p13 = pnand %p1440_p12, %p1437_p11 }
  0x50   : > { %1445 = shalt.err (!%p1442_p13)
}
  0x51   : > { %s1446_s14 = scalar_lea.vmem %s1862_s28, 16  ;;  %s1453_s2 = scalar_lea.vmem %s1862_s28, 32 }
  0x52   : > { %p1447_p0 = scmp.ne.s32.totalorder %s1862_s28, %s1446_s14  ;;  %p1454_p7 = scmp.lt.s32.totalorder %s1862_s28, %s1862_s28 }
  0x53   : > { %p1455_p9 = scmp.lt.s32.totalorder %s1453_s2, %s1446_s14 }
  0x54   : > { %p1449_p3 = pnand %p1447_p0, %p1874_p8 }
  0x55   : > { %p1456_p4 = por %p1455_p9, %p1454_p7 }
  0x56   : > { %p1450_p5 = pneg %p1449_p3 }
  0x58   : > { %p1457_p10 = pnand %p1456_p4, %p1450_p5 }
  0x5a   : > { %1460 = shalt.err (!%p1457_p10)
}
  0x5b   : > { %1265 = dma.hbm_to_vmem [thread:$0]  (!%p1858_p6), %s2320_s6, 16, %s1862_s28, [#allocation9]  }
  0x5c   : > { %s2321_s4 = sld [smem:[#allocation27_spill]] }
  0x62   : > { %s1461_s1 = scalar_lea.hbm %s2321_s4, 16 }
  0x63   : > { %p1462_p11 = scmp.ne.s32.totalorder %s2321_s4, %s1461_s1  ;;  %p1468_p0 = scmp.lt.u32.totalorder %s1461_s1, %s2321_s4 }
  0x65   : > { %p1464_p12 = pnand %p1462_p11, %p1874_p8 }
  0x67   : > { %p1465_p13 = pneg %p1464_p12 }
  0x69   : > { %p1470_p3 = pnand %p1468_p0, %p1465_p13 }
  0x6b   : > { %1473 = shalt.err (!%p1470_p3)
}
  0x6c   : > { %s1474_s28 = scalar_lea.vmem %s1864_s10, 16  ;;  %s1481_s0 = scalar_lea.vmem %s1864_s10, 32 }
  0x6d   : > { %p1475_p5 = scmp.ne.s32.totalorder %s1864_s10, %s1474_s28  ;;  %p1482_p4 = scmp.lt.s32.totalorder %s1864_s10, %s1864_s10 }
  0x6e   : > { %p1483_p10 = scmp.lt.s32.totalorder %s1481_s0, %s1474_s28 }
  0x6f   : > { %p1477_p7 = pnand %p1475_p5, %p1874_p8 }
  0x70   : > { %p1484_p11 = por %p1483_p10, %p1482_p4 }
  0x71   : > { %p1478_p9 = pneg %p1477_p7 }
  0x73   : > { %p1485_p12 = pnand %p1484_p11, %p1478_p9 }
  0x75   : > { %1488 = shalt.err (!%p1485_p12)
}
  0x76   : > { %1262 = dma.hbm_to_vmem [thread:$0]  (!%p1858_p6), %s2321_s4, 16, %s1864_s10, [#allocation6]  }
  0x77   : > { %s1716_s24 = smov [#allocation10]   ;;  %s1717_s12 = smov [#allocation11]  }
  0x78   : > { %s374_s30 = sshll.u32 %s1716_s24, 4  ;;  %s385_s5 = sshll.u32 %s1717_s12, 4  ;;  %s375_s30 = int_to_ptr.vmem [resolvable:$true] %s374_s30  ;;  %s1943_s5 = int_to_ptr.vmem [resolvable:$true] %s385_s5 }
  0x79   : > { %s2322_s7 = sld [smem:[#allocation30_spill]] }
  0x7f   : > { %s1489_s13 = scalar_lea.hbm %s2322_s7, 16 }
  0x80   : > { %p1490_p13 = scmp.ne.s32.totalorder %s2322_s7, %s1489_s13  ;;  %p1496_p5 = scmp.lt.u32.totalorder %s1489_s13, %s2322_s7 }
  0x82   : > { %p1492_p0 = pnand %p1490_p13, %p1874_p8 }
  0x84   : > { %p1493_p3 = pneg %p1492_p0 }
  0x86   : > { %p1498_p7 = pnand %p1496_p5, %p1493_p3 }
  0x88   : > { %1501 = shalt.err (!%p1498_p7)
}
  0x89   : > { %s1502_s0 = scalar_lea.vmem %s375_s30, 16  ;;  %s1509_s14 = scalar_lea.vmem %s375_s30, 32 }
  0x8a   : > { %p1503_p9 = scmp.ne.s32.totalorder %s375_s30, %s1502_s0  ;;  %p1510_p11 = scmp.lt.s32.totalorder %s375_s30, %s375_s30 }
  0x8b   : > { %p1511_p12 = scmp.lt.s32.totalorder %s1509_s14, %s1502_s0 }
  0x8c   : > { %p1505_p4 = pnand %p1503_p9, %p1874_p8 }
  0x8d   : > { %p1512_p2 = por %p1511_p12, %p1510_p11 }
  0x8e   : > { %p1506_p10 = pneg %p1505_p4 }
  0x90   : > { %p1513_p1 = pnand %p1512_p2, %p1506_p10 }
  0x92   : > { %1516 = shalt.err (!%p1513_p1)
}
  0x93   : > { %1268 = dma.hbm_to_vmem [thread:$0]  (!%p1858_p6), %s2322_s7, 16, %s375_s30, [#allocation9]  }
  0x94   : > { %s2323_s8 = sld [smem:[#allocation31_spill]] }
  0x9a   : > { %s1517_s9 = scalar_lea.hbm %s2323_s8, 16 }
  0x9b   : > { %p1518_p13 = scmp.ne.s32.totalorder %s2323_s8, %s1517_s9  ;;  %p1524_p1 = scmp.lt.u32.totalorder %s1517_s9, %s2323_s8 }
  0x9d   : > { %p1520_p0 = pnand %p1518_p13, %p1874_p8 }
  0x9f   : > { %p1521_p3 = pneg %p1520_p0 }
  0xa1   : > { %p1526_p2 = pnand %p1524_p1, %p1521_p3 }
  0xa3   : > { %1529 = shalt.err (!%p1526_p2)
}
  0xa4   : > { %s1530_s30 = scalar_lea.vmem %s1943_s5, 16  ;;  %s1537_s10 = scalar_lea.vmem %s1943_s5, 32 }
  0xa5   : > { %p1531_p5 = scmp.ne.s32.totalorder %s1943_s5, %s1530_s30  ;;  %p1538_p4 = scmp.lt.s32.totalorder %s1943_s5, %s1943_s5 }
  0xa6   : > { %p1539_p10 = scmp.lt.s32.totalorder %s1537_s10, %s1530_s30 }
  0xa7   : > { %p1533_p7 = pnand %p1531_p5, %p1874_p8 }
  0xa8   : > { %p1540_p11 = por %p1539_p10, %p1538_p4 }
  0xa9   : > { %p1534_p9 = pneg %p1533_p7 }
  0xab   : > { %p1541_p12 = pnand %p1540_p11, %p1534_p9 }
  0xad   : > { %1544 = shalt.err (!%p1541_p12)
}
  0xae   : > { %1271 = dma.hbm_to_vmem [thread:$0]  (!%p1858_p6), %s2323_s8, 16, %s1943_s5, [#allocation12]  }
  0xaf   : > { %s1124_s23 = sadd.s32 4294967294, %s1709_s27   ;;  %s39_s15 = sadd.s32 1, %s1701_s25 }
  0xb0   : > { %p40_p8 = scmp.ge.s32.totalorder %s39_s15, 3  ;;  %s42_s2 = sadd.s32 1, %s1705_s26 }
  0xb1   : > { %s103_s24 = sadd.s32 1, %s1689_s22  ;;  %p110_p13 = scmp.ne.s32.totalorder %s1689_s22, %s1685_s21 }
  0xb2   : > { %s2359_s15 = smov (%p40_p8, %s39_s15), 0  ;;  %s2324_s12 = sld [smem:[#allocation21_spill]] }
  0xb3   : > { %s2361_s2 = smov (!%p40_p8, %s42_s2), %s1705_s26  ;;  %p111_p0 = scmp.eq.s32.totalorder %s1709_s27, 0 }
  0xb4   : > { %p116_p6 = scmp.ne.s32.totalorder %s1685_s21, %s1681_s20  ;;  %p44_p3 = scmp.ge.s32.totalorder %s2361_s2, 2 }
  0xb5   : > { %s295_s5 = ssub.s32 %s1701_s25, %s2359_s15  ;;  %p2001_p1 = por %p111_p0, %p110_p13 }
  0xb6   : > { %p2326_p2 = scmp.ne.s32.totalorder %s2312_s29, 0  ;;  %s2363_s2 = smov (%p44_p3, %s2361_s2), 0 }
  0xb7   : > { %s299_s13 = sadd.s32 1, %s1677_s19  ;;  %p309_p7 = scmp.ne.s32.totalorder %s1677_s19, %s1673_s18 }
  0xb8   : > { %p2007_p5 = por %p2326_p2, %p116_p6  ;;  %s100_s20 = ssub.s32 %s1705_s26, %s2363_s2 }
  0xb9   : > { %p315_p9 = scmp.ne.s32.totalorder %s1673_s18, %s1669_s17  ;;  %p101_p4 = scmp.eq.s32.totalorder %s100_s20, 0 }
  0xba   : > { %s296_s11 = sor.u32 %s295_s5, %s100_s20  ;;  %p2328_p11 = scmp.ne.s32.totalorder %s2324_s12, 0 }
  0xbb   : > { %p297_p10 = scmp.eq.s32.totalorder %s296_s11, 0  ;;  %p316_p8 = scmp.eq.s32.totalorder %s1124_s23, 5 }
  0xbc   : > { %p2022_p12 = por %p2328_p11, %p309_p7  ;;  %p1285_p13 = scmp.lt.s32.totalorder %s1709_s27, 6 }
  0xbd   : > { %s2027_s28 = scalar_select %p101_p4, %s1689_s22, %s103_s24  }
  0xbe   : > { %s2329_s16 = scalar_select %p2022_p12, 1, 0 }
  0xbf   : > { %s2030_s30 = scalar_select %p297_p10, %s1677_s19, %s299_s13  }
  0xc0   : > { %s419_s10 = sand.u32 1, %s1689_s22   ;;  %s1132_s0 = sshll.u32 %s1705_s26, 4 }
  0xc1   : > { %p2035_p0 = por %p316_p8, %p315_p9  ;;  %s2331_s20 = sld [smem:[#allocation25_spill]] }
  0xc2   : > { %s422_s24 = scalar_lea.vmem [#allocation2], %s419_s10  ;;  %p2046_p6 = pnand %p1285_p13, %p2001_p1 }
  0xc3   : > { %s2330_s14 = scalar_select %p2035_p0, 1, 0 }
  0xc4   : > { %s429_s13 = sshll.u32 %s422_s24, 4  ;;  %s420_s4 = scalar_lea.sflag [#allocation3], %s419_s10  ;;  %s2050_s13 = int_to_ptr.vmem [resolvable:$true] %s429_s13 }
  0xc5   : > { %p1547_p2 = pneg %p2046_p6 }
  0xc7   : > { %s2332_s11 = smov %s2331_s20  ;;  %s2042_s12 = scalar_lea.hbm %s2331_s20, %s1132_s0 }
  0xc8   : > { %s1545_s6 = scalar_lea.hbm %s2042_s12, 16  ;;  %s1550_s1 = scalar_lea.hbm %s2332_s11, 32 }
  0xc9   : > { %p1546_p3 = scmp.ne.s32.totalorder %s2042_s12, %s1545_s6  ;;  %p1551_p1 = scmp.lt.u32.totalorder %s2042_s12, %s2332_s11 }
  0xca   : > { %p1552_p4 = scmp.lt.u32.totalorder %s1550_s1, %s1545_s6  ;;  %p1554_p11 = scmp.lt.u32.totalorder %s1545_s6, %s2042_s12 }
  0xcb   : > { %p1548_p7 = pnand %p1547_p2, %p1546_p3 }
  0xcc   : > { %p1553_p10 = por %p1552_p4, %p1551_p1 }
  0xcd   : > { %p1549_p9 = pneg %p1548_p7 }
  0xce   : > { %p1555_p8 = por %p1554_p11, %p1553_p10 }
  0xd0   : > { %p1556_p13 = pnand %p1555_p8, %p1549_p9 }
  0xd2   : > { %1559 = shalt.err (!%p1556_p13)
}
  0xd3   : > { %s1560_s10 = scalar_lea.vmem %s2050_s13, 16  ;;  %s1718_s24 = smov [#allocation2]  }
  0xd4   : > { %p1561_p3 = scmp.ne.s32.totalorder %s2050_s13, %s1560_s10  ;;  %s1565_s3 = sshll.u32 %s1718_s24, 4  ;;  %s1566_s3 = int_to_ptr.vmem [resolvable:$false] %s1565_s3 }
  0xd5   : > { %s1567_s0 = scalar_lea.vmem %s1566_s3, 32  ;;  %p1568_p12 = scmp.lt.s32.totalorder %s2050_s13, %s1566_s3 }
  0xd6   : > { %p1563_p7 = pnand %p1561_p3, %p1547_p2  ;;  %p1569_p1 = scmp.lt.s32.totalorder %s1567_s0, %s1560_s10 }
  0xd8   : > { %p1564_p0 = pneg %p1563_p7  ;;  %p1570_p4 = por %p1569_p1, %p1568_p12 }
  0xda   : > { %p1571_p10 = pnand %p1570_p4, %p1564_p0 }
  0xdc   : > { %1574 = shalt.err (!%p1571_p10)
}
  0xdd   : > { %1275 = dma.hbm_to_vmem [thread:$0]  (!%p2046_p6), %s2042_s12, 16, %s2050_s13, %s420_s4  }
  0xde   : > { %s2334_s6 = sld [smem:[#allocation22_spill]] }
  0xe4   : > { %p2335_p9 = scmp.ne.s32.totalorder %s2334_s6, 0 }
  0xe5   : > { %s440_s1 = sand.u32 (!%p2335_p9), 1, %s1685_s21  }
  0xe6   : > { %438 = sbr.rel (%p2335_p9) target bundleno = 1785 (0x6f9), region = 64  ;;  %s441_s5 = scalar_lea.sflag (!%p2335_p9), [#allocation3], %s440_s1 }
  0xe7   : > { %s2080_s20 = scalar_lea.vmem (!%p2335_p9), [#allocation2], %s440_s1 }
  0xed   : > { %1648 = dma.done.wait (%p2007_p5), %s441_s5, 16  }
  0xee   : > { %1650 = vsyncadd (%p2007_p5), %s441_s5, 4294967280  ;;  %p2336_p12 = scmp.ne.s32.totalorder %s2312_s29, 0 }
  0xf0   : > { %1652 = dma.done.wait (%p2336_p12), [#allocation6], 272  }
  0xf1   : > { %1654 = vsyncadd (%p2336_p12), [#allocation6], 4294967024 }
  0xf2   : > { %1656 = dma.done.wait (%p2336_p12), [#allocation9], 32  }
  0xf3   : > { %1658 = vsyncadd (%p2336_p12), [#allocation9], 4294967264 }
  0xf4   : > { %1660 = dma.done.wait (%p2336_p12), [#allocation12], 16  }
  0xf5   : > { %1662 = vsyncadd (%p2336_p12), [#allocation12], 4294967280  ;;  %s2337_s4 = sld [smem:[#allocation20_spill]]  ;;  %s2338_s9 = sld [smem:[#allocation19_spill]]  ;;  %v1719_v0 = vmov 0.0   ;;  %vm1720_vm0 = vmmov 0   ;;  %v730_v61 = vlaneseq }
  0xf6   : > { %1182 = vmatprep.subr.bf16.mxu0 %v1719_v0  ;;  %1186 = vmatprep.mubr.msk.bf16.mxu0 %vm1720_vm0, %v1719_v0  ;;  %v1389_v1 = vld [vmem:[#allocation5] sm:$0xff]   ;;  %s2339_s0 = sld [smem:[#allocation23_spill]]  ;;  %v1390_v2 = vld [vmem:[#allocation5 + $0x8] sm:$0xff]   ;;  %vm556_vm1 = vcmask 261120   ;;  %v2153_v9 = vld [vmem:[#allocation7] ss:$0 sm:$0xff] }
  0xf7   : > { %1190 = vmatprep.subr.bf16.mxu1 %v1719_v0  ;;  %1198 = vmatprep.mubr.msk.bf16.mxu1 %vm1720_vm0, %v1719_v0  ;;  %vm670_vm2 = vcmask 523264   ;;  %v2159_v45 = vld [vmem:[#allocation8] ss:$0 sm:$0xff]  ;;  %s2341_s5 = sld [smem:[#allocation24_spill]]  ;;  %p2346_p2 = scmp.ne.s32.totalorder %s2329_s16, 0 }
  0xf8   : > { %1183 = vmatpush3.bf16.msra.mxu0 %v1389_v1 }
  0xf9   : > { %1184 = vmatprep.subr.bf16.mxu0 %v1719_v0 }
  0xfb   : > { %p512_p5 = scmp.lt.s32.totalorder %s2337_s4, 1  ;;  %p514_p0 = scmp.lt.s32.totalorder %s2338_s9, 2 }
  0xfc   : > { %1185 = vmatpush3.bf16.msra.mxu0 %v1390_v2 }
  0xfd   : > { %s2104_s12 = scalar_select %p512_p5, %s2337_s4, 1  ;;  %1202 = vmatprep.subr.bf16.mxu0 %v1719_v0 }
  0xfe   : > { %s515_s29 = scalar_select %p514_p0, %s2338_s9, 2 }
  0xff   : > { %s1230_s13 = smul.u32 3, %s2104_s12 }
 0x101   : > { %s517_s23 = sadd.s32 %s1230_s13, %s515_s29  ;;  %s2340_s29 = sld [smem:[#allocation28_spill]] }
 0x102   : > { %s1140_s10 = sshll.u32 %s517_s23, 3  ;;  %s522_s13 = scalar_lea.vmem %s2341_s5, %s2104_s12 }
 0x103   : > { %s519_s6 = scalar_lea.vmem %s2339_s0, %s1140_s10  ;;  %s2342_s23 = sld [smem:[#allocation32_spill]] }
 0x104   : > { %v2114_v3 = vld [vmem:[%s519_s6] sm:$0xff]  ;;  %s509_s0 = sand.u32 1, %s1673_s18   ;;  %s1231_s6 = smul.u32 3, %s2337_s4 }
 0x105   : > { %v532_v4 = vpack.c.bf16 %v2114_v3, %v2114_v3  ;;  %s1139_s1 = sshll.u32 %s509_s0, 3  ;;  %s2344_s12 = sld [smem:[#allocation33_spill]] }
 0x106   : > { %s964_s5 = sadd.s32 %s2338_s9, %s1231_s6  ;;  %s511_s24 = scalar_lea.vmem [#allocation13], %s1139_s1 }
 0x107   : > { %1187 = vmatmul.mubr.msk.bf16.vlgmr.msra.gmra.mrb[0].mxu0 %vm556_vm1, %v532_v4  ;;  %v2128_v5 = vld [vmem:[%s2340_s29] sm:$0xff]   ;;  %v2135_v6 = vld [vmem:[%s2340_s29 + $0x8] sm:$0xff]   ;;  %v2142_v7 = vld [vmem:[%s2340_s29 + $0x10] sm:$0xff]   ;;  %s968_s3 = sshll.u32 %s511_s24, 4  ;;  %s953_s4 = scalar_lea.sflag [#allocation4], %s509_s0  ;;  %s2212_s3 = int_to_ptr.vmem [resolvable:$true] %s968_s3 }
 0x108   : > { %1203 = vmatpush3.bf16.msra.mxu0 %v1389_v1  ;;  %1206 = vmatprep.mubr.msk.bf16.mxu0 %vm1720_vm0, %v1719_v0  ;;  %v2149_v8 = vld [vmem:[%s2340_s29 + $0x18] sm:$0xff]   ;;  %v731_v1 = vshrl.u32 %v730_v61, 7  ;;  %s1575_s9 = scalar_lea.vmem %s2212_s3, 128  ;;  %s1721_s6 = smov [#allocation13]  }
 0x109   : > { %1204 = vmatprep.subr.bf16.mxu0 %v1719_v0  ;;  %1191 = vmatpush3.bf16.msra.mxu1 %v2128_v5  ;;  %v529_v4 = vld [vmem:[#allocation11] sm:$0x1]  ;;  %s2343_s10 = smov %s2342_s23  ;;  %p1576_p6 = scmp.ne.s32.totalorder %s2212_s3, %s1575_s9 }
 0x10a   : > { %1192 = vmatprep.subr.bf16.mxu1 %v1719_v0  ;;  %s1579_s1 = sshll.u32 %s1721_s6, 4  ;;  %s1580_s1 = int_to_ptr.vmem [resolvable:$false] %s1579_s1 }
 0x10b   : > { %p1577_p11 = pnand %p1576_p6, %p2346_p2  ;;  %s1581_s7 = scalar_lea.vmem %s1580_s1, 256 }
 0x10c   : > { %1205 = vmatpush3.bf16.msra.mxu0 %v1390_v2  ;;  %v525_v2 = vld [vmem:[%s522_s13] sm:$0x1]  ;;  %p1582_p13 = scmp.lt.s32.totalorder %s2212_s3, %s1580_s1  ;;  %p1583_p3 = scmp.lt.s32.totalorder %s1581_s7, %s1575_s9 }
 0x10d   : > { %1210 = vmatprep.subr.bf16.mxu0 %v1719_v0  ;;  %1193 = vmatpush3.bf16.msra.mxu1 %v2135_v6  ;;  %p1578_p8 = pneg %p1577_p11 }
 0x10e   : > { %1194 = vmatprep.subr.bf16.mxu1 %v1719_v0  ;;  %p1584_p7 = por %p1583_p3, %p1582_p13 }
 0x110   : > { %p1585_p1 = pnand %p1584_p7, %p1578_p8 }
 0x111   : > { %1195 = vmatpush3.bf16.msra.mxu1 %v2142_v7 }
 0x112   : > { %1196 = vmatprep.subr.bf16.mxu1 %v1719_v0 }
 0x115   : > { %1197 = vmatpush3.bf16.msra.mxu1 %v2149_v8 }
 0x116   : > { %1222 = vmatprep.subr.bf16.mxu1 %v1719_v0 }
 0x1da   : > { %v594_v10 = vpop.f32.mrb[0].mxu0 }
 0x1db   : > { %v595_v11 = vadd.f32 %v2153_v9, %v594_v10  ;;  %v1188_v12 = vpop.f32.mrb[1].mxu0 }
 0x1dc   : > { %v597_v13 = vpop.f32.mrb[2].mxu0  ;;  %v732_v12 = vsub.s32 0, %v731_v1  ;;  %v1395_v1 = vld [vmem:[%s2342_s23] sm:$0xff]   ;;  %s1160_s23 = sshll.u32 %s964_s5, 7 }
 0x1dd   : > { %v601_v14 = vmul.f32 0.70710677, %v595_v11  ;;  %v1189_v15 = vpop.f32.mrb[3].mxu0  ;;  %v600_v41 = vmul.f32 0.5, %v595_v11  ;;  %v530_v11 = vmul.f32 %v529_v4, %v525_v2  ;;  %v526_v13 = vld [vmem:[%s2080_s20] sm:$0x1] }
 0x1df   : > { %v1145_v16 = vclamps-f32 %v601_v14, 4.0  ;;  %v531_v15 = vadd.f32 %v530_v11, %v526_v13 }
 0x1e1   : > { %v604_v17 = vmul.f32 %v1145_v16, %v1145_v16 }
 0x1e3   : > { %v605_v18 = vmul.f32 -2.7261424e-10, %v604_v17  ;;  %v617_v19 = vmul.f32 -1.45660715e-05, %v604_v17 }
 0x1e5   : > { %v606_v20 = vadd.f32 2.7706815e-08, %v605_v18  ;;  %v618_v21 = vadd.f32 -0.00021337405, %v617_v19  ;;  %v2173_v18 = vrot.slane %v531_v15, %v732_v12 }
 0x1e7   : > { %v607_v22 = vmul.f32 %v606_v20, %v604_v17  ;;  %v619_v23 = vmul.f32 %v618_v21, %v604_v17 }
 0x1e9   : > { %v608_v24 = vadd.f32 -2.101024e-06, %v607_v22  ;;  %v620_v25 = vadd.f32 -0.001682827, %v619_v23 }
 0x1eb   : > { %v609_v26 = vmul.f32 %v608_v24, %v604_v17  ;;  %v621_v27 = vmul.f32 %v620_v25, %v604_v17 }
 0x1ed   : > { %v610_v28 = vadd.f32 -5.6925062e-05, %v609_v26  ;;  %v622_v29 = vadd.f32 -0.0073733293, %v621_v27 }
 0x1ef   : > { %v611_v30 = vmul.f32 %v610_v28, %v604_v17  ;;  %v623_v31 = vmul.f32 %v622_v29, %v604_v17 }
 0x1f1   : > { %v612_v32 = vadd.f32 -0.00073499064, %v611_v30  ;;  %v624_v33 = vadd.f32 -0.014264739, %v623_v31 }
 0x1f3   : > { %v613_v34 = vmul.f32 %v612_v32, %v604_v17  ;;  %1397 = vrcp.f32 %v624_v33 }
 0x1f5   : > { %v614_v35 = vadd.f32 -0.0029546001, %v613_v34 }
 0x1f7   : > { %v615_v36 = vmul.f32 %v614_v35, %v604_v17 }
 0x1f9   : > { %v616_v37 = vadd.f32 -0.016096033, %v615_v36 }
 0x1fb   : > { %v625_v38 = vmul.f32 %v1145_v16, %v616_v37 }
 0x1fd   : > { %v1398_v39 = vpop.eup %1397 }
 0x1fe   : > { %v627_v40 = vmul.f32 %v1398_v39, %v625_v38 }
 0x200   : > { %v628_v42 = vadd.f32 1.0, %v627_v40 }
 0x202   : > { %v629_v43 = vmul.f32 %v628_v42, %v600_v41 }
 0x204   : > { %v630_v44 = vpack.c.bf16 %v629_v43, %v629_v43 }
 0x206   : > { %1199 = vmatmul.mubr.msk.bf16.vlgmr.msra.gmra.mrb[0].mxu1 %vm670_vm2, %v630_v44 }
 0x207   : > { %1226 = vmatprep.mubr.msk.bf16.mxu1 %vm1720_vm0, %v1719_v0  ;;  %1223 = vmatpush3.bf16.msra.mxu1 %v1395_v1 }
 0x208   : > { %1224 = vmatprep.subr.bf16.mxu1 %v1719_v0 }
 0x2d9   : > { %v708_v46 = vpop.f32.mrb[0].mxu1 }
 0x2da   : > { %v709_v47 = vadd.f32 %v2159_v45, %v708_v46  ;;  %v1200_v48 = vpop.f32.mrb[1].mxu1 }
 0x2db   : > { %v711_v49 = vpop.f32.mrb[2].mxu1 }
 0x2dc   : > { %v714_v50 = vadd.f32 %v709_v47, %v2114_v3  ;;  %v1201_v51 = vpop.f32.mrb[3].mxu1  ;;  %v527_v3 = vld [vmem:[#allocation10] sm:$0x1] }
 0x2dd   : > { %v528_v10 = vmul.f32 %v527_v3, %v525_v2 }
 0x2de   : > { %v715_v52 = vsel %vm556_vm1, %v714_v50, 0.0  ;;  %v718_v53 = vmul.f32 %v714_v50, %v714_v50 }
 0x2df   : > { %716 = vadd.xlane.f32.xlu0 %v715_v52  ;;  %v2170_v14 = vrot.slane %v528_v10, %v732_v12 }
 0x2e0   : > { %v719_v54 = vsel %vm556_vm1, %v718_v53, 0.0 }
 0x2e3   : > { %720 = vadd.xlane.f32.xlu0 %v719_v54 }
 0x36c   : > { %v717_v55 = vpop.xlane.xlu0 %716 }
 0x36d   : > { %v722_v56 = vmul.f32 0.03125, %v717_v55 }
 0x36f   : > { %v724_v58 = vmul.f32 %v722_v56, %v722_v56 }
 0x370   : > { %v721_v57 = vpop.xlane.xlu0 %720 }
 0x371   : > { %v723_v59 = vmul.f32 0.03125, %v721_v57 }
 0x373   : > { %v725_v60 = vsub.f32 %v723_v59, %v724_v58 }
 0x375   : > { %v726_v62 = vmax.f32 %v725_v60, 0.0 }
 0x377   : > { %v727_v63 = vadd.f32 1e-05, %v726_v62 }
 0x379   : > { %1399 = vrsqrt.f32 %v727_v63 }
 0x383   : > { %v1400_v16 = vpop.eup %1399 }
 0x384   : > { %v735_v17 = vmul.f32 %v1400_v16, %v2170_v14 }
 0x386   : > { %v737_v19 = vmul.f32 %v735_v17, %v722_v56  ;;  %v736_v20 = vmul.f32 %v735_v17, %v714_v50 }
 0x388   : > { %v744_v21 = vsub.f32 %v2173_v18, %v737_v19 }
 0x38a   : > { %v745_v22 = vadd.f32 %v744_v21, %v736_v20 }
 0x38c   : > { %v746_v23 = vpack.c.bf16 %v745_v22, %v745_v22 }
 0x38e   : > { %1207 = vmatmul.mubr.msk.bf16.vlgmr.msra.gmra.mrb[4].mxu0 %vm556_vm1, %v746_v23  ;;  %v1155_v23 = vld [vmem:[%s2344_s12] ss:$0 sm:$0xff] }
 0x38f   : > { %1211 = vmatpush3.bf16.msra.mxu0 %v2128_v5  ;;  %1218 = vmatprep.mubr.msk.bf16.mxu0 %vm1720_vm0, %v1719_v0 }
 0x390   : > { %1212 = vmatprep.subr.bf16.mxu0 %v1719_v0 }
 0x393   : > { %1213 = vmatpush3.bf16.msra.mxu0 %v2135_v6 }
 0x394   : > { %1214 = vmatprep.subr.bf16.mxu0 %v1719_v0 }
 0x397   : > { %1215 = vmatpush3.bf16.msra.mxu0 %v2142_v7 }
 0x398   : > { %1216 = vmatprep.subr.bf16.mxu0 %v1719_v0 }
 0x39b   : > { %1217 = vmatpush3.bf16.msra.mxu0 %v2149_v8 }
 0x461   : > { %v784_v24 = vpop.f32.mrb[4].mxu0 }
 0x462   : > { %v785_v25 = vadd.f32 %v2153_v9, %v784_v24  ;;  %v1208_v26 = vpop.f32.mrb[5].mxu0 }
 0x463   : > { %v787_v5 = vpop.f32.mrb[6].mxu0 }
 0x464   : > { %v791_v27 = vmul.f32 0.70710677, %v785_v25  ;;  %v1209_v28 = vpop.f32.mrb[7].mxu0  ;;  %v790_v51 = vmul.f32 0.5, %v785_v25 }
 0x466   : > { %v1153_v29 = vclamps-f32 %v791_v27, 4.0 }
 0x468   : > { %v794_v30 = vmul.f32 %v1153_v29, %v1153_v29 }
 0x46a   : > { %v795_v31 = vmul.f32 -2.7261424e-10, %v794_v30  ;;  %v807_v32 = vmul.f32 -1.45660715e-05, %v794_v30 }
 0x46c   : > { %v796_v6 = vadd.f32 2.7706815e-08, %v795_v31  ;;  %v808_v33 = vadd.f32 -0.00021337405, %v807_v32 }
 0x46e   : > { %v797_v34 = vmul.f32 %v796_v6, %v794_v30  ;;  %v809_v35 = vmul.f32 %v808_v33, %v794_v30 }
 0x470   : > { %v798_v7 = vadd.f32 -2.101024e-06, %v797_v34  ;;  %v810_v36 = vadd.f32 -0.001682827, %v809_v35 }
 0x472   : > { %v799_v37 = vmul.f32 %v798_v7, %v794_v30  ;;  %v811_v38 = vmul.f32 %v810_v36, %v794_v30 }
 0x474   : > { %v800_v8 = vadd.f32 -5.6925062e-05, %v799_v37  ;;  %v812_v39 = vadd.f32 -0.0073733293, %v811_v38 }
 0x476   : > { %v801_v40 = vmul.f32 %v800_v8, %v794_v30  ;;  %v813_v9 = vmul.f32 %v812_v39, %v794_v30 }
 0x478   : > { %v802_v41 = vadd.f32 -0.00073499064, %v801_v40  ;;  %v814_v42 = vadd.f32 -0.014264739, %v813_v9 }
 0x47a   : > { %v803_v43 = vmul.f32 %v802_v41, %v794_v30  ;;  %1401 = vrcp.f32 %v814_v42 }
 0x47c   : > { %v804_v44 = vadd.f32 -0.0029546001, %v803_v43 }
 0x47e   : > { %v805_v46 = vmul.f32 %v804_v44, %v794_v30 }
 0x480   : > { %v806_v47 = vadd.f32 -0.016096033, %v805_v46 }
 0x482   : > { %v815_v48 = vmul.f32 %v1153_v29, %v806_v47 }
 0x484   : > { %v1402_v49 = vpop.eup %1401 }
 0x485   : > { %v817_v50 = vmul.f32 %v1402_v49, %v815_v48 }
 0x487   : > { %v818_v52 = vadd.f32 1.0, %v817_v50 }
 0x489   : > { %v819_v53 = vmul.f32 %v818_v52, %v790_v51 }
 0x48b   : > { %v820_v54 = vpack.c.bf16 %v819_v53, %v819_v53 }
 0x48d   : > { %1219 = vmatmul.mubr.msk.bf16.vlgmr.msra.gmra.mrb[8].mxu0 %vm670_vm2, %v820_v54 }
 0x560   : > { %v858_v55 = vpop.f32.mrb[8].mxu0 }
 0x561   : > { %v859_v56 = vadd.f32 %v2159_v45, %v858_v55  ;;  %v1220_v57 = vpop.f32.mrb[9].mxu0  ;;  %v1396_v45 = vld [vmem:[%s2343_s10 + $0x8] sm:$0xff]   ;;  %s2345_s10 = sld [smem:[#allocation34_spill]] }
 0x562   : > { %v861_v58 = vpop.f32.mrb[10].mxu0  ;;  %1225 = vmatpush3.bf16.msra.mxu1 %v1396_v45 }
 0x563   : > { %v864_v59 = vadd.f32 %v859_v56, %v745_v22  ;;  %v1221_v60 = vpop.f32.mrb[11].mxu0 }
 0x565   : > { %v865_v61 = vsel %vm556_vm1, %v864_v59, 0.0  ;;  %v868_v62 = vmul.f32 %v864_v59, %v864_v59 }
 0x566   : > { %866 = vadd.xlane.f32.xlu1 %v865_v61 }
 0x567   : > { %v869_v63 = vsel %vm556_vm1, %v868_v62, 0.0  ;;  %s2210_s11 = scalar_lea.hbm %s2345_s10, %s1160_s23 }
 0x56a   : > { %870 = vadd.xlane.f32.xlu1 %v869_v63 }
 0x5f3   : > { %v867_v2 = vpop.xlane.xlu1 %866 }
 0x5f4   : > { %v872_v3 = vmul.f32 0.03125, %v867_v2 }
 0x5f6   : > { %v874_v10 = vmul.f32 %v872_v3, %v872_v3 }
 0x5f7   : > { %v871_v4 = vpop.xlane.xlu1 %870 }
 0x5f8   : > { %v873_v11 = vmul.f32 0.03125, %v871_v4 }
 0x5fa   : > { %v875_v12 = vsub.f32 %v873_v11, %v874_v10 }
 0x5fc   : > { %v876_v13 = vmax.f32 %v875_v12, 0.0 }
 0x5fe   : > { %v877_v15 = vadd.f32 1e-05, %v876_v13 }
 0x600   : > { %1403 = vrsqrt.f32 %v877_v15 }
 0x60a   : > { %v1404_v16 = vpop.eup %1403 }
 0x60b   : > { %v879_v17 = vmul.f32 %v1404_v16, %v2170_v14 }
 0x60d   : > { %v881_v19 = vmul.f32 %v879_v17, %v872_v3  ;;  %v880_v20 = vmul.f32 %v879_v17, %v864_v59 }
 0x60f   : > { %v882_v0 = vsub.f32 %v2173_v18, %v881_v19 }
 0x611   : > { %v883_v21 = vadd.f32 %v882_v0, %v880_v20 }
 0x613   : > { %v884_v22 = vpack.c.bf16 %v883_v21, %v883_v21 }
 0x615   : > { %1227 = vmatmul.mubr.msk.bf16.vlgmr.msra.gmra.mrb[4].mxu1 %vm556_vm1, %v884_v22 }
 0x6e8   : > { %v945_v14 = vpop.f32.mrb[4].mxu1 }
 0x6e9   : > { %v946_v24 = vadd.f32 %v1155_v23, %v945_v14  ;;  %v1228_v25 = vpop.f32.mrb[5].mxu1 }
 0x6ea   : > { %v948_v18 = vpop.f32.mrb[6].mxu1 }
 0x6eb   : > { %951 = vst [vmem:[%s511_s24] sm:$0xff] %v946_v24  ;;  %v1229_v26 = vpop.f32.mrb[7].mxu1 }
 0x6ec   : > { %1588 = shalt.err (!%p1585_p1)
}
 0x6ed   : > { %s1589_s8 = scalar_lea.hbm %s2210_s11, 128  ;;  %s1593_s13 = scalar_lea.hbm %s2345_s10, 768 }
 0x6ee   : > { %p1590_p4 = scmp.ne.s32.totalorder %s2210_s11, %s1589_s8  ;;  %p1594_p12 = scmp.lt.u32.totalorder %s2210_s11, %s2345_s10 }
 0x6ef   : > { %p1595_p5 = scmp.lt.u32.totalorder %s1593_s13, %s1589_s8  ;;  %p1597_p6 = scmp.lt.u32.totalorder %s1589_s8, %s2210_s11 }
 0x6f0   : > { %p1591_p10 = pnand %p1590_p4, %p2346_p2 }
 0x6f1   : > { %p1596_p0 = por %p1595_p5, %p1594_p12 }
 0x6f2   : > { %p1592_p9 = pneg %p1591_p10 }
 0x6f3   : > { %p1598_p11 = por %p1597_p6, %p1596_p0 }
 0x6f5   : > { %p1599_p8 = pnand %p1598_p11, %p1592_p9 }
 0x6f7   : > { %1602 = shalt.err (!%p1599_p8)
}
 0x6f8   : > { %1254 = dma.vmem_to_hbm [thread:$0]  (%p2346_p2), %s2212_s3, 128, %s2210_s11, %s953_s4  }
 0x6f9 PF: > { %p1291_p13 = scmp.ge.s32.totalorder %s1709_s27, 2  ;;  %s980_s23 = sand.u32 1, %s1669_s17  }
 0x6fa   : > { %p2347_p3 = scmp.ne.s32.totalorder %s2330_s14, 0  ;;  %s981_s24 = scalar_lea.sflag [#allocation4], %s980_s23 }
 0x6fc   : > { %p1277_p7 = pnand %p1291_p13, %p2347_p3 }
 0x6fe   : > { %1664 = dma.done.wait (!%p1277_p7), %s981_s24, 128  }
 0x6ff   : > { %1666 = vsyncadd (!%p1277_p7), %s981_s24, 4294967168  ;;  %s30_s27 = sadd.s32 1, %s1709_s27   ;;  %s2348_s17 = smov %s1673_s18 }
 0x700   : > { %p27_p1 = scmp.ge.s32.totalorder %s30_s27, 8   ;;  %s2349_s18 = smov %s1677_s19 }
 0x701   : > { %s2350_s19 = smov %s2030_s30  ;;  %s2351_s20 = smov %s1685_s21 }
 0x702   : > { %s2352_s21 = smov %s1689_s22  ;;  %s2353_s22 = smov %s2027_s28 }
 0x703   : > { %s2354_s23 = smov %s1701_s25  ;;  %s2355_s24 = smov %s1705_s26 }
 0x704   : > { %s2356_s25 = smov %s2359_s15  ;;  %s2357_s26 = smov %s2363_s2 }
 0x705   :  { %29 = sbr.rel (!%p27_p1) target bundleno = 25 (0x19), region = 135 }
 0x70c   :  { %986 = vsyncpa [#allocation3], 1 }
 0x70d   :  { %988 = vsyncpa [#allocation3 + $0x1], 1 }
 0x70e   :  { %989 = vsyncpa [#allocation6], 1 }
 0x70f   :  { %990 = vsyncpa [#allocation9], 1 }
 0x710   :  { %991 = vsyncpa [#allocation12], 1 }
 0x711   :  { %992 = vsyncpa [#allocation4], 1 }
 0x712   :  { %994 = vsyncpa [#allocation4 + $0x1], 1 }

// kernel: tpu_custom_call.1
= control target key start
LH: loop header
LB: loop body
LE: loop exit
PB: predicated region body
PF: predicated region fallthrough
CT: control target
= control target key end

     0   :  { %s2272_s0 = inlined_call_operand.vmem [shape: f32[2,24,32], index: 0, kind: input, shape index: {}]   ;;  %s2273_s1 = inlined_call_operand.vmem [shape: f32[2,1,32], index: 1, kind: input, shape index: {}]   ;;  %s2274_s2 = inlined_call_operand.hbm [shape: f32[2,1,32], index: 2, kind: input, shape index: {}]   ;;  %s2275_s3 = inlined_call_operand.hbm [shape: bf16[32,64], index: 3, kind: input, shape index: {}]   ;;  %s2276_s4 = inlined_call_operand.hbm [shape: f32[1,64], index: 4, kind: input, shape index: {}]   ;;  %s2277_s5 = inlined_call_operand.vmem [shape: bf16[64,32], index: 5, kind: input, shape index: {}]   ;;  %s2278_s6 = inlined_call_operand.hbm [shape: f32[1,32], index: 6, kind: input, shape index: {}]   ;;  %s2279_s7 = inlined_call_operand.hbm [shape: f32[1,32], index: 7, kind: input, shape index: {}]   ;;  %s2280_s8 = inlined_call_operand.hbm [shape: f32[1,32], index: 8, kind: input, shape index: {}]   ;;  %s2281_s9 = inlined_call_operand.vmem [shape: bf16[32,128], index: 9, kind: input, shape index: {}]   ;;  %s2282_s10 = inlined_call_operand.vmem [shape: f32[1,128], index: 10, kind: input, shape index: {}]   ;;  %s2283_s11 = inlined_call_operand.hbm [shape: f32[2,24,128], index: 11, kind: output, shape index: {}]  }
   0x1   :  { %2298 = sst [smem:[#allocation23_spill]] %s2272_s0 }
   0x2   :  { %2299 = sst [smem:[#allocation24_spill]] %s2273_s1 }
   0x3   :  { %2300 = sst [smem:[#allocation25_spill]] %s2274_s2 }
   0x4   :  { %2301 = sst [smem:[#allocation26_spill]] %s2275_s3 }
   0x5   :  { %2302 = sst [smem:[#allocation27_spill]] %s2276_s4 }
   0x6   :  { %2303 = sst [smem:[#allocation28_spill]] %s2277_s5 }
   0x7   :  { %2304 = sst [smem:[#allocation29_spill]] %s2278_s6 }
   0x8   :  { %2305 = sst [smem:[#allocation30_spill]] %s2279_s7 }
   0x9   :  { %2306 = sst [smem:[#allocation31_spill]] %s2280_s8 }
   0xa   :  { %2307 = sst [smem:[#allocation32_spill]] %s2281_s9 }
   0xb   :  { %2308 = sst [smem:[#allocation33_spill]] %s2282_s10 }
   0xc   :  { %2309 = sst [smem:[#allocation34_spill]] %s2283_s11 }
   0xd   :  { %16 = vsyncpa [#allocation3], 0 }
   0xe   :  { %18 = vsyncpa [#allocation3 + $0x1], 0 }
   0xf   :  { %19 = vsyncpa [#allocation6], 0 }
  0x10   :  { %20 = vsyncpa [#allocation9], 0 }
  0x11   :  { %21 = vsyncpa [#allocation12], 0 }
  0x12   :  { %22 = vsyncpa [#allocation4], 0 }
  0x13   :  { %24 = vsyncpa [#allocation4 + $0x1], 0  ;;  %s1782_s17 = smov 0   ;;  %s1784_s18 = smov 0  }
  0x14   :  { %s1786_s19 = smov 0   ;;  %s1788_s20 = smov 0  }
  0x15   :  { %s1790_s21 = smov 0   ;;  %s1792_s22 = smov 0  }
  0x16   :  { %s1794_s23 = smov 0   ;;  %s1796_s24 = smov 0  }
  0x17   :  { %s1798_s25 = smov 0   ;;  %s1800_s26 = smov 0  }
  0x18   :  { %s1802_s27 = smov 0  }
  0x19 LB: > { %2310 = sst [smem:[#allocation19_spill]] %s1693_s23  ;;  %s1123_s28 = sadd.s32 4294967295, %s1709_s27   ;;  %s1709_s27 = sphi %s1802_s27, %s30_s27   ;;  %s1705_s26 = sphi %s1800_s26, %s2357_s26   ;;  %s1701_s25 = sphi %s1798_s25, %s2356_s25   ;;  %s1697_s24 = sphi %s1796_s24, %s2355_s24   ;;  %s1693_s23 = sphi %s1794_s23, %s2354_s23   ;;  %s1689_s22 = sphi %s1792_s22, %s2353_s22   ;;  %s1685_s21 = sphi %s1790_s21, %s2352_s21   ;;  %s1681_s20 = sphi %s1788_s20, %s2351_s20   ;;  %s1677_s19 = sphi %s1786_s19, %s2350_s19   ;;  %s1673_s18 = sphi %s1784_s18, %s2349_s18   ;;  %s1669_s17 = sphi %s1782_s17, %s2348_s17  }
  0x1a   : > { %2311 = sst [smem:[#allocation20_spill]] %s1697_s24  ;;  %p1125_p0 = scmp.ge.s32.totalorder %s1709_s27, 1 }
  0x1b   : > { %p1839_p1 = scmp.eq.s32.totalorder %s1123_s28, 0  ;;  %p1843_p2 = scmp.eq.s32.totalorder %s1123_s28, 5 }
  0x1c   : > { %p323_p3 = scmp.lt.s32.totalorder %s1709_s27, 7  ;;  %s1711_s13 = smov [#allocation5]  }
  0x1d   : > { %s2312_s29 = scalar_select %p1839_p1, 1, 0 }
  0x1e   : > { %s2313_s30 = scalar_select %p1843_p2, 1, 0 }
  0x1f   : > { %p1848_p4 = pnand %p1125_p0, %p323_p3  ;;  %s335_s14 = sshll.u32 %s1711_s13, 4  ;;  %s1852_s14 = int_to_ptr.vmem [resolvable:$true] %s335_s14 }
  0x20   : > { %2314 = sst [smem:[#allocation21_spill]] %s2313_s30  ;;  %s1712_s16 = smov [#allocation8]  }
  0x21   : > { %s2315_s12 = scalar_select %p1848_p4, 1, 0 }
  0x22   : > { %p1256_p5 = pneg %p1848_p4  ;;  %s363_s28 = sshll.u32 %s1712_s16, 4  ;;  %s1862_s28 = int_to_ptr.vmem [resolvable:$true] %s363_s28 }
  0x23   : > { %2316 = sst [smem:[#allocation22_spill]] %s2315_s12  ;;  %s1713_s11 = smov [#allocation7]  }
  0x24   : > { %p1858_p6 = pnand %p1256_p5, %p1839_p1  ;;  %s349_s10 = sshll.u32 %s1713_s11, 4  ;;  %s1864_s10 = int_to_ptr.vmem [resolvable:$true] %s349_s10 }
  0x25   : > { %s2318_s3 = sld [smem:[#allocation26_spill]] }
  0x26   : > { %p1874_p8 = pneg %p1858_p6 }
  0x2b   : > { %s1405_s1 = scalar_lea.hbm %s2318_s3, 256 }
  0x2c   : > { %p1406_p7 = scmp.ne.s32.totalorder %s2318_s3, %s1405_s1  ;;  %p1412_p11 = scmp.lt.u32.totalorder %s1405_s1, %s2318_s3 }
  0x2e   : > { %p1408_p9 = pnand %p1874_p8, %p1406_p7 }
  0x30   : > { %p1409_p10 = pneg %p1408_p9 }
  0x32   : > { %p1414_p12 = pnand %p1412_p11, %p1409_p10 }
  0x34   : > { %1417 = shalt.err (!%p1414_p12)
}
  0x35   : > { %s1418_s0 = scalar_lea.vmem %s1852_s14, 256  ;;  %p1426_p5 = scmp.lt.s32.totalorder %s1852_s14, %s1852_s14 }
  0x36   : > { %p1419_p13 = scmp.ne.s32.totalorder %s1852_s14, %s1418_s0  ;;  %p1427_p4 = scmp.lt.s32.totalorder %s1418_s0, %s1418_s0 }
  0x38   : > { %p1421_p0 = pnand %p1419_p13, %p1874_p8  ;;  %p1428_p7 = por %p1427_p4, %p1426_p5 }
  0x3a   : > { %p1422_p3 = pneg %p1421_p0 }
  0x3c   : > { %p1429_p9 = pnand %p1428_p7, %p1422_p3 }
  0x3e   : > { %1432 = shalt.err (!%p1429_p9)
}
  0x3f   : > { %s1714_s5 = smov 64   ;;  %s1715_s1 = smov 4  }
  0x40   : > { %1259 = dma.hbm_to_vmem [thread:$0]  (!%p1858_p6), %s2318_s3, 256, %s1852_s14, [#allocation6], %s1714_s5, %s1714_s5, %s1715_s1  }
  0x41   : > { %s2320_s6 = sld [smem:[#allocation29_spill]] }
  0x47   : > { %s1433_s24 = scalar_lea.hbm %s2320_s6, 16 }
  0x48   : > { %p1434_p4 = scmp.ne.s32.totalorder %s2320_s6, %s1433_s24  ;;  %p1440_p12 = scmp.lt.u32.totalorder %s1433_s24, %s2320_s6 }
  0x4a   : > { %p1436_p10 = pnand %p1434_p4, %p1874_p8 }
  0x4c   : > { %p1437_p11 = pneg %p1436_p10 }
  0x4e   : > { %p1442_p13 = pnand %p1440_p12, %p1437_p11 }
  0x50   : > { %1445 = shalt.err (!%p1442_p13)
}
  0x51   : > { %s1446_s14 = scalar_lea.vmem %s1862_s28, 16  ;;  %s1453_s2 = scalar_lea.vmem %s1862_s28, 32 }
  0x52   : > { %p1447_p0 = scmp.ne.s32.totalorder %s1862_s28, %s1446_s14  ;;  %p1454_p7 = scmp.lt.s32.totalorder %s1862_s28, %s1862_s28 }
  0x53   : > { %p1455_p9 = scmp.lt.s32.totalorder %s1453_s2, %s1446_s14 }
  0x54   : > { %p1449_p3 = pnand %p1447_p0, %p1874_p8 }
  0x55   : > { %p1456_p4 = por %p1455_p9, %p1454_p7 }
  0x56   : > { %p1450_p5 = pneg %p1449_p3 }
  0x58   : > { %p1457_p10 = pnand %p1456_p4, %p1450_p5 }
  0x5a   : > { %1460 = shalt.err (!%p1457_p10)
}
  0x5b   : > { %1265 = dma.hbm_to_vmem [thread:$0]  (!%p1858_p6), %s2320_s6, 16, %s1862_s28, [#allocation9]  }
  0x5c   : > { %s2321_s4 = sld [smem:[#allocation27_spill]] }
  0x62   : > { %s1461_s1 = scalar_lea.hbm %s2321_s4, 16 }
  0x63   : > { %p1462_p11 = scmp.ne.s32.totalorder %s2321_s4, %s1461_s1  ;;  %p1468_p0 = scmp.lt.u32.totalorder %s1461_s1, %s2321_s4 }
  0x65   : > { %p1464_p12 = pnand %p1462_p11, %p1874_p8 }
  0x67   : > { %p1465_p13 = pneg %p1464_p12 }
  0x69   : > { %p1470_p3 = pnand %p1468_p0, %p1465_p13 }
  0x6b   : > { %1473 = shalt.err (!%p1470_p3)
}
  0x6c   : > { %s1474_s28 = scalar_lea.vmem %s1864_s10, 16  ;;  %s1481_s0 = scalar_lea.vmem %s1864_s10, 32 }
  0x6d   : > { %p1475_p5 = scmp.ne.s32.totalorder %s1864_s10, %s1474_s28  ;;  %p1482_p4 = scmp.lt.s32.totalorder %s1864_s10, %s1864_s10 }
  0x6e   : > { %p1483_p10 = scmp.lt.s32.totalorder %s1481_s0, %s1474_s28 }
  0x6f   : > { %p1477_p7 = pnand %p1475_p5, %p1874_p8 }
  0x70   : > { %p1484_p11 = por %p1483_p10, %p1482_p4 }
  0x71   : > { %p1478_p9 = pneg %p1477_p7 }
  0x73   : > { %p1485_p12 = pnand %p1484_p11, %p1478_p9 }
  0x75   : > { %1488 = shalt.err (!%p1485_p12)
}
  0x76   : > { %1262 = dma.hbm_to_vmem [thread:$0]  (!%p1858_p6), %s2321_s4, 16, %s1864_s10, [#allocation6]  }
  0x77   : > { %s1716_s24 = smov [#allocation10]   ;;  %s1717_s12 = smov [#allocation11]  }
  0x78   : > { %s374_s30 = sshll.u32 %s1716_s24, 4  ;;  %s385_s5 = sshll.u32 %s1717_s12, 4  ;;  %s375_s30 = int_to_ptr.vmem [resolvable:$true] %s374_s30  ;;  %s1943_s5 = int_to_ptr.vmem [resolvable:$true] %s385_s5 }
  0x79   : > { %s2322_s7 = sld [smem:[#allocation30_spill]] }
  0x7f   : > { %s1489_s13 = scalar_lea.hbm %s2322_s7, 16 }
  0x80   : > { %p1490_p13 = scmp.ne.s32.totalorder %s2322_s7, %s1489_s13  ;;  %p1496_p5 = scmp.lt.u32.totalorder %s1489_s13, %s2322_s7 }
  0x82   : > { %p1492_p0 = pnand %p1490_p13, %p1874_p8 }
  0x84   : > { %p1493_p3 = pneg %p1492_p0 }
  0x86   : > { %p1498_p7 = pnand %p1496_p5, %p1493_p3 }
  0x88   : > { %1501 = shalt.err (!%p1498_p7)
}
  0x89   : > { %s1502_s0 = scalar_lea.vmem %s375_s30, 16  ;;  %s1509_s14 = scalar_lea.vmem %s375_s30, 32 }
  0x8a   : > { %p1503_p9 = scmp.ne.s32.totalorder %s375_s30, %s1502_s0  ;;  %p1510_p11 = scmp.lt.s32.totalorder %s375_s30, %s375_s30 }
  0x8b   : > { %p1511_p12 = scmp.lt.s32.totalorder %s1509_s14, %s1502_s0 }
  0x8c   : > { %p1505_p4 = pnand %p1503_p9, %p1874_p8 }
  0x8d   : > { %p1512_p2 = por %p1511_p12, %p1510_p11 }
  0x8e   : > { %p1506_p10 = pneg %p1505_p4 }
  0x90   : > { %p1513_p1 = pnand %p1512_p2, %p1506_p10 }
  0x92   : > { %1516 = shalt.err (!%p1513_p1)
}
  0x93   : > { %1268 = dma.hbm_to_vmem [thread:$0]  (!%p1858_p6), %s2322_s7, 16, %s375_s30, [#allocation9]  }
  0x94   : > { %s2323_s8 = sld [smem:[#allocation31_spill]] }
  0x9a   : > { %s1517_s9 = scalar_lea.hbm %s2323_s8, 16 }
  0x9b   : > { %p1518_p13 = scmp.ne.s32.totalorder %s2323_s8, %s1517_s9  ;;  %p1524_p1 = scmp.lt.u32.totalorder %s1517_s9, %s2323_s8 }
  0x9d   : > { %p1520_p0 = pnand %p1518_p13, %p1874_p8 }
  0x9f   : > { %p1521_p3 = pneg %p1520_p0 }
  0xa1   : > { %p1526_p2 = pnand %p1524_p1, %p1521_p3 }
  0xa3   : > { %1529 = shalt.err (!%p1526_p2)
}
  0xa4   : > { %s1530_s30 = scalar_lea.vmem %s1943_s5, 16  ;;  %s1537_s10 = scalar_lea.vmem %s1943_s5, 32 }
  0xa5   : > { %p1531_p5 = scmp.ne.s32.totalorder %s1943_s5, %s1530_s30  ;;  %p1538_p4 = scmp.lt.s32.totalorder %s1943_s5, %s1943_s5 }
  0xa6   : > { %p1539_p10 = scmp.lt.s32.totalorder %s1537_s10, %s1530_s30 }
  0xa7   : > { %p1533_p7 = pnand %p1531_p5, %p1874_p8 }
  0xa8   : > { %p1540_p11 = por %p1539_p10, %p1538_p4 }
  0xa9   : > { %p1534_p9 = pneg %p1533_p7 }
  0xab   : > { %p1541_p12 = pnand %p1540_p11, %p1534_p9 }
  0xad   : > { %1544 = shalt.err (!%p1541_p12)
}
  0xae   : > { %1271 = dma.hbm_to_vmem [thread:$0]  (!%p1858_p6), %s2323_s8, 16, %s1943_s5, [#allocation12]  }
  0xaf   : > { %s1124_s23 = sadd.s32 4294967294, %s1709_s27   ;;  %s39_s15 = sadd.s32 1, %s1701_s25 }
  0xb0   : > { %p40_p8 = scmp.ge.s32.totalorder %s39_s15, 3  ;;  %s42_s2 = sadd.s32 1, %s1705_s26 }
  0xb1   : > { %s103_s24 = sadd.s32 1, %s1689_s22  ;;  %p110_p13 = scmp.ne.s32.totalorder %s1689_s22, %s1685_s21 }
  0xb2   : > { %s2359_s15 = smov (%p40_p8, %s39_s15), 0  ;;  %s2324_s12 = sld [smem:[#allocation21_spill]] }
  0xb3   : > { %s2361_s2 = smov (!%p40_p8, %s42_s2), %s1705_s26  ;;  %p111_p0 = scmp.eq.s32.totalorder %s1709_s27, 0 }
  0xb4   : > { %p116_p6 = scmp.ne.s32.totalorder %s1685_s21, %s1681_s20  ;;  %p44_p3 = scmp.ge.s32.totalorder %s2361_s2, 2 }
  0xb5   : > { %s295_s5 = ssub.s32 %s1701_s25, %s2359_s15  ;;  %p2001_p1 = por %p111_p0, %p110_p13 }
  0xb6   : > { %p2326_p2 = scmp.ne.s32.totalorder %s2312_s29, 0  ;;  %s2363_s2 = smov (%p44_p3, %s2361_s2), 0 }
  0xb7   : > { %s299_s13 = sadd.s32 1, %s1677_s19  ;;  %p309_p7 = scmp.ne.s32.totalorder %s1677_s19, %s1673_s18 }
  0xb8   : > { %p2007_p5 = por %p2326_p2, %p116_p6  ;;  %s100_s20 = ssub.s32 %s1705_s26, %s2363_s2 }
  0xb9   : > { %p315_p9 = scmp.ne.s32.totalorder %s1673_s18, %s1669_s17  ;;  %p101_p4 = scmp.eq.s32.totalorder %s100_s20, 0 }
  0xba   : > { %s296_s11 = sor.u32 %s295_s5, %s100_s20  ;;  %p2328_p11 = scmp.ne.s32.totalorder %s2324_s12, 0 }
  0xbb   : > { %p297_p10 = scmp.eq.s32.totalorder %s296_s11, 0  ;;  %p316_p8 = scmp.eq.s32.totalorder %s1124_s23, 5 }
  0xbc   : > { %p2022_p12 = por %p2328_p11, %p309_p7  ;;  %p1285_p13 = scmp.lt.s32.totalorder %s1709_s27, 6 }
  0xbd   : > { %s2027_s28 = scalar_select %p101_p4, %s1689_s22, %s103_s24  }
  0xbe   : > { %s2329_s16 = scalar_select %p2022_p12, 1, 0 }
  0xbf   : > { %s2030_s30 = scalar_select %p297_p10, %s1677_s19, %s299_s13  }
  0xc0   : > { %s419_s10 = sand.u32 1, %s1689_s22   ;;  %s1132_s0 = sshll.u32 %s1705_s26, 4 }
  0xc1   : > { %p2035_p0 = por %p316_p8, %p315_p9  ;;  %s2331_s20 = sld [smem:[#allocation25_spill]] }
  0xc2   : > { %s422_s24 = scalar_lea.vmem [#allocation2], %s419_s10  ;;  %p2046_p6 = pnand %p1285_p13, %p2001_p1 }
  0xc3   : > { %s2330_s14 = scalar_select %p2035_p0, 1, 0 }
  0xc4   : > { %s429_s13 = sshll.u32 %s422_s24, 4  ;;  %s420_s4 = scalar_lea.sflag [#allocation3], %s419_s10  ;;  %s2050_s13 = int_to_ptr.vmem [resolvable:$true] %s429_s13 }
  0xc5   : > { %p1547_p2 = pneg %p2046_p6 }
  0xc7   : > { %s2332_s11 = smov %s2331_s20  ;;  %s2042_s12 = scalar_lea.hbm %s2331_s20, %s1132_s0 }
  0xc8   : > { %s1545_s6 = scalar_lea.hbm %s2042_s12, 16  ;;  %s1550_s1 = scalar_lea.hbm %s2332_s11, 32 }
  0xc9   : > { %p1546_p3 = scmp.ne.s32.totalorder %s2042_s12, %s1545_s6  ;;  %p1551_p1 = scmp.lt.u32.totalorder %s2042_s12, %s2332_s11 }
  0xca   : > { %p1552_p4 = scmp.lt.u32.totalorder %s1550_s1, %s1545_s6  ;;  %p1554_p11 = scmp.lt.u32.totalorder %s1545_s6, %s2042_s12 }
  0xcb   : > { %p1548_p7 = pnand %p1547_p2, %p1546_p3 }
  0xcc   : > { %p1553_p10 = por %p1552_p4, %p1551_p1 }
  0xcd   : > { %p1549_p9 = pneg %p1548_p7 }
  0xce   : > { %p1555_p8 = por %p1554_p11, %p1553_p10 }
  0xd0   : > { %p1556_p13 = pnand %p1555_p8, %p1549_p9 }
  0xd2   : > { %1559 = shalt.err (!%p1556_p13)
}
  0xd3   : > { %s1560_s10 = scalar_lea.vmem %s2050_s13, 16  ;;  %s1718_s24 = smov [#allocation2]  }
  0xd4   : > { %p1561_p3 = scmp.ne.s32.totalorder %s2050_s13, %s1560_s10  ;;  %s1565_s3 = sshll.u32 %s1718_s24, 4  ;;  %s1566_s3 = int_to_ptr.vmem [resolvable:$false] %s1565_s3 }
  0xd5   : > { %s1567_s0 = scalar_lea.vmem %s1566_s3, 32  ;;  %p1568_p12 = scmp.lt.s32.totalorder %s2050_s13, %s1566_s3 }
  0xd6   : > { %p1563_p7 = pnand %p1561_p3, %p1547_p2  ;;  %p1569_p1 = scmp.lt.s32.totalorder %s1567_s0, %s1560_s10 }
  0xd8   : > { %p1564_p0 = pneg %p1563_p7  ;;  %p1570_p4 = por %p1569_p1, %p1568_p12 }
  0xda   : > { %p1571_p10 = pnand %p1570_p4, %p1564_p0 }
  0xdc   : > { %1574 = shalt.err (!%p1571_p10)
}
  0xdd   : > { %1275 = dma.hbm_to_vmem [thread:$0]  (!%p2046_p6), %s2042_s12, 16, %s2050_s13, %s420_s4  }
  0xde   : > { %s2334_s6 = sld [smem:[#allocation22_spill]] }
  0xe4   : > { %p2335_p9 = scmp.ne.s32.totalorder %s2334_s6, 0 }
  0xe5   : > { %s440_s1 = sand.u32 (!%p2335_p9), 1, %s1685_s21  }
  0xe6   : > { %438 = sbr.rel (%p2335_p9) target bundleno = 1785 (0x6f9), region = 64  ;;  %s441_s5 = scalar_lea.sflag (!%p2335_p9), [#allocation3], %s440_s1 }
  0xe7   : > { %s2080_s20 = scalar_lea.vmem (!%p2335_p9), [#allocation2], %s440_s1 }
  0xed   : > { %1648 = dma.done.wait (%p2007_p5), %s441_s5, 16  }
  0xee   : > { %1650 = vsyncadd (%p2007_p5), %s441_s5, 4294967280  ;;  %p2336_p12 = scmp.ne.s32.totalorder %s2312_s29, 0 }
  0xf0   : > { %1652 = dma.done.wait (%p2336_p12), [#allocation6], 272  }
  0xf1   : > { %1654 = vsyncadd (%p2336_p12), [#allocation6], 4294967024 }
  0xf2   : > { %1656 = dma.done.wait (%p2336_p12), [#allocation9], 32  }
  0xf3   : > { %1658 = vsyncadd (%p2336_p12), [#allocation9], 4294967264 }
  0xf4   : > { %1660 = dma.done.wait (%p2336_p12), [#allocation12], 16  }
  0xf5   : > { %1662 = vsyncadd (%p2336_p12), [#allocation12], 4294967280  ;;  %s2337_s4 = sld [smem:[#allocation20_spill]]  ;;  %s2338_s9 = sld [smem:[#allocation19_spill]]  ;;  %v1719_v0 = vmov 0.0   ;;  %vm1720_vm0 = vmmov 0   ;;  %v730_v61 = vlaneseq }
  0xf6   : > { %1182 = vmatprep.subr.bf16.mxu0 %v1719_v0  ;;  %1186 = vmatprep.mubr.msk.bf16.mxu0 %vm1720_vm0, %v1719_v0  ;;  %v1389_v1 = vld [vmem:[#allocation5] sm:$0xff]   ;;  %s2339_s0 = sld [smem:[#allocation23_spill]]  ;;  %v1390_v2 = vld [vmem:[#allocation5 + $0x8] sm:$0xff]   ;;  %vm556_vm1 = vcmask 261120   ;;  %v2153_v9 = vld [vmem:[#allocation7] ss:$0 sm:$0xff] }
  0xf7   : > { %1190 = vmatprep.subr.bf16.mxu1 %v1719_v0  ;;  %1198 = vmatprep.mubr.msk.bf16.mxu1 %vm1720_vm0, %v1719_v0  ;;  %vm670_vm2 = vcmask 523264   ;;  %v2159_v45 = vld [vmem:[#allocation8] ss:$0 sm:$0xff]  ;;  %s2341_s5 = sld [smem:[#allocation24_spill]]  ;;  %p2346_p2 = scmp.ne.s32.totalorder %s2329_s16, 0 }
  0xf8   : > { %1183 = vmatpush3.bf16.msra.mxu0 %v1389_v1 }
  0xf9   : > { %1184 = vmatprep.subr.bf16.mxu0 %v1719_v0 }
  0xfb   : > { %p512_p5 = scmp.lt.s32.totalorder %s2337_s4, 1  ;;  %p514_p0 = scmp.lt.s32.totalorder %s2338_s9, 2 }
  0xfc   : > { %1185 = vmatpush3.bf16.msra.mxu0 %v1390_v2 }
  0xfd   : > { %s2104_s12 = scalar_select %p512_p5, %s2337_s4, 1  ;;  %1202 = vmatprep.subr.bf16.mxu0 %v1719_v0 }
  0xfe   : > { %s515_s29 = scalar_select %p514_p0, %s2338_s9, 2 }
  0xff   : > { %s1230_s13 = smul.u32 3, %s2104_s12 }
 0x101   : > { %s517_s23 = sadd.s32 %s1230_s13, %s515_s29  ;;  %s2340_s29 = sld [smem:[#allocation28_spill]] }
 0x102   : > { %s1140_s10 = sshll.u32 %s517_s23, 3  ;;  %s522_s13 = scalar_lea.vmem %s2341_s5, %s2104_s12 }
 0x103   : > { %s519_s6 = scalar_lea.vmem %s2339_s0, %s1140_s10  ;;  %s2342_s23 = sld [smem:[#allocation32_spill]] }
 0x104   : > { %v2114_v3 = vld [vmem:[%s519_s6] sm:$0xff]  ;;  %s509_s0 = sand.u32 1, %s1673_s18   ;;  %s1231_s6 = smul.u32 3, %s2337_s4 }
 0x105   : > { %v532_v4 = vpack.c.bf16 %v2114_v3, %v2114_v3  ;;  %s1139_s1 = sshll.u32 %s509_s0, 3  ;;  %s2344_s12 = sld [smem:[#allocation33_spill]] }
 0x106   : > { %s964_s5 = sadd.s32 %s2338_s9, %s1231_s6  ;;  %s511_s24 = scalar_lea.vmem [#allocation13], %s1139_s1 }
 0x107   : > { %1187 = vmatmul.mubr.msk.bf16.vlgmr.msra.gmra.mrb[0].mxu0 %vm556_vm1, %v532_v4  ;;  %v2128_v5 = vld [vmem:[%s2340_s29] sm:$0xff]   ;;  %v2135_v6 = vld [vmem:[%s2340_s29 + $0x8] sm:$0xff]   ;;  %v2142_v7 = vld [vmem:[%s2340_s29 + $0x10] sm:$0xff]   ;;  %s968_s3 = sshll.u32 %s511_s24, 4  ;;  %s953_s4 = scalar_lea.sflag [#allocation4], %s509_s0  ;;  %s2212_s3 = int_to_ptr.vmem [resolvable:$true] %s968_s3 }
 0x108   : > { %1203 = vmatpush3.bf16.msra.mxu0 %v1389_v1  ;;  %1206 = vmatprep.mubr.msk.bf16.mxu0 %vm1720_vm0, %v1719_v0  ;;  %v2149_v8 = vld [vmem:[%s2340_s29 + $0x18] sm:$0xff]   ;;  %v731_v1 = vshrl.u32 %v730_v61, 7  ;;  %s1575_s9 = scalar_lea.vmem %s2212_s3, 128  ;;  %s1721_s6 = smov [#allocation13]  }
 0x109   : > { %1204 = vmatprep.subr.bf16.mxu0 %v1719_v0  ;;  %1191 = vmatpush3.bf16.msra.mxu1 %v2128_v5  ;;  %v529_v4 = vld [vmem:[#allocation11] sm:$0x1]  ;;  %s2343_s10 = smov %s2342_s23  ;;  %p1576_p6 = scmp.ne.s32.totalorder %s2212_s3, %s1575_s9 }
 0x10a   : > { %1192 = vmatprep.subr.bf16.mxu1 %v1719_v0  ;;  %s1579_s1 = sshll.u32 %s1721_s6, 4  ;;  %s1580_s1 = int_to_ptr.vmem [resolvable:$false] %s1579_s1 }
 0x10b   : > { %p1577_p11 = pnand %p1576_p6, %p2346_p2  ;;  %s1581_s7 = scalar_lea.vmem %s1580_s1, 256 }
 0x10c   : > { %1205 = vmatpush3.bf16.msra.mxu0 %v1390_v2  ;;  %v525_v2 = vld [vmem:[%s522_s13] sm:$0x1]  ;;  %p1582_p13 = scmp.lt.s32.totalorder %s2212_s3, %s1580_s1  ;;  %p1583_p3 = scmp.lt.s32.totalorder %s1581_s7, %s1575_s9 }
 0x10d   : > { %1210 = vmatprep.subr.bf16.mxu0 %v1719_v0  ;;  %1193 = vmatpush3.bf16.msra.mxu1 %v2135_v6  ;;  %p1578_p8 = pneg %p1577_p11 }
 0x10e   : > { %1194 = vmatprep.subr.bf16.mxu1 %v1719_v0  ;;  %p1584_p7 = por %p1583_p3, %p1582_p13 }
 0x110   : > { %p1585_p1 = pnand %p1584_p7, %p1578_p8 }
 0x111   : > { %1195 = vmatpush3.bf16.msra.mxu1 %v2142_v7 }
 0x112   : > { %1196 = vmatprep.subr.bf16.mxu1 %v1719_v0 }
 0x115   : > { %1197 = vmatpush3.bf16.msra.mxu1 %v2149_v8 }
 0x116   : > { %1222 = vmatprep.subr.bf16.mxu1 %v1719_v0 }
 0x1da   : > { %v594_v10 = vpop.f32.mrb[0].mxu0 }
 0x1db   : > { %v595_v11 = vadd.f32 %v2153_v9, %v594_v10  ;;  %v1188_v12 = vpop.f32.mrb[1].mxu0 }
 0x1dc   : > { %v597_v13 = vpop.f32.mrb[2].mxu0  ;;  %v732_v12 = vsub.s32 0, %v731_v1  ;;  %v1395_v1 = vld [vmem:[%s2342_s23] sm:$0xff]   ;;  %s1160_s23 = sshll.u32 %s964_s5, 7 }
 0x1dd   : > { %v601_v14 = vmul.f32 0.70710677, %v595_v11  ;;  %v1189_v15 = vpop.f32.mrb[3].mxu0  ;;  %v600_v41 = vmul.f32 0.5, %v595_v11  ;;  %v530_v11 = vmul.f32 %v529_v4, %v525_v2  ;;  %v526_v13 = vld [vmem:[%s2080_s20] sm:$0x1] }
 0x1df   : > { %v1145_v16 = vclamps-f32 %v601_v14, 4.0  ;;  %v531_v15 = vadd.f32 %v530_v11, %v526_v13 }
 0x1e1   : > { %v604_v17 = vmul.f32 %v1145_v16, %v1145_v16 }
 0x1e3   : > { %v605_v18 = vmul.f32 -2.7261424e-10, %v604_v17  ;;  %v617_v19 = vmul.f32 -1.45660715e-05, %v604_v17 }
 0x1e5   : > { %v606_v20 = vadd.f32 2.7706815e-08, %v605_v18  ;;  %v618_v21 = vadd.f32 -0.00021337405, %v617_v19  ;;  %v2173_v18 = vrot.slane %v531_v15, %v732_v12 }
 0x1e7   : > { %v607_v22 = vmul.f32 %v606_v20, %v604_v17  ;;  %v619_v23 = vmul.f32 %v618_v21, %v604_v17 }
 0x1e9   : > { %v608_v24 = vadd.f32 -2.101024e-06, %v607_v22  ;;  %v620_v25 = vadd.f32 -0.001682827, %v619_v23 }
 0x1eb   : > { %v609_v26 = vmul.f32 %v608_v24, %v604_v17  ;;  %v621_v27 = vmul.f32 %v620_v25, %v604_v17 }
 0x1ed   : > { %v610_v28 = vadd.f32 -5.6925062e-05, %v609_v26  ;;  %v622_v29 = vadd.f32 -0.0073733293, %v621_v27 }
 0x1ef   : > { %v611_v30 = vmul.f32 %v610_v28, %v604_v17  ;;  %v623_v31 = vmul.f32 %v622_v29, %v604_v17 }
 0x1f1   : > { %v612_v32 = vadd.f32 -0.00073499064, %v611_v30  ;;  %v624_v33 = vadd.f32 -0.014264739, %v623_v31 }
 0x1f3   : > { %v613_v34 = vmul.f32 %v612_v32, %v604_v17  ;;  %1397 = vrcp.f32 %v624_v33 }
 0x1f5   : > { %v614_v35 = vadd.f32 -0.0029546001, %v613_v34 }
 0x1f7   : > { %v615_v36 = vmul.f32 %v614_v35, %v604_v17 }
 0x1f9   : > { %v616_v37 = vadd.f32 -0.016096033, %v615_v36 }
 0x1fb   : > { %v625_v38 = vmul.f32 %v1145_v16, %v616_v37 }
 0x1fd   : > { %v1398_v39 = vpop.eup %1397 }
 0x1fe   : > { %v627_v40 = vmul.f32 %v1398_v39, %v625_v38 }
 0x200   : > { %v628_v42 = vadd.f32 1.0, %v627_v40 }
 0x202   : > { %v629_v43 = vmul.f32 %v628_v42, %v600_v41 }
 0x204   : > { %v630_v44 = vpack.c.bf16 %v629_v43, %v629_v43 }
 0x206   : > { %1199 = vmatmul.mubr.msk.bf16.vlgmr.msra.gmra.mrb[0].mxu1 %vm670_vm2, %v630_v44 }
 0x207   : > { %1226 = vmatprep.mubr.msk.bf16.mxu1 %vm1720_vm0, %v1719_v0  ;;  %1223 = vmatpush3.bf16.msra.mxu1 %v1395_v1 }
 0x208   : > { %1224 = vmatprep.subr.bf16.mxu1 %v1719_v0 }
 0x2d9   : > { %v708_v46 = vpop.f32.mrb[0].mxu1 }
 0x2da   : > { %v709_v47 = vadd.f32 %v2159_v45, %v708_v46  ;;  %v1200_v48 = vpop.f32.mrb[1].mxu1 }
 0x2db   : > { %v711_v49 = vpop.f32.mrb[2].mxu1 }
 0x2dc   : > { %v714_v50 = vadd.f32 %v709_v47, %v2114_v3  ;;  %v1201_v51 = vpop.f32.mrb[3].mxu1  ;;  %v527_v3 = vld [vmem:[#allocation10] sm:$0x1] }
 0x2dd   : > { %v528_v10 = vmul.f32 %v527_v3, %v525_v2 }
 0x2de   : > { %v715_v52 = vsel %vm556_vm1, %v714_v50, 0.0  ;;  %v718_v53 = vmul.f32 %v714_v50, %v714_v50 }
 0x2df   : > { %716 = vadd.xlane.f32.xlu0 %v715_v52  ;;  %v2170_v14 = vrot.slane %v528_v10, %v732_v12 }
 0x2e0   : > { %v719_v54 = vsel %vm556_vm1, %v718_v53, 0.0 }
 0x2e3   : > { %720 = vadd.xlane.f32.xlu0 %v719_v54 }
 0x36c   : > { %v717_v55 = vpop.xlane.xlu0 %716 }
 0x36d   : > { %v722_v56 = vmul.f32 0.03125, %v717_v55 }
 0x36f   : > { %v724_v58 = vmul.f32 %v722_v56, %v722_v56 }
 0x370   : > { %v721_v57 = vpop.xlane.xlu0 %720 }
 0x371   : > { %v723_v59 = vmul.f32 0.03125, %v721_v57 }
 0x373   : > { %v725_v60 = vsub.f32 %v723_v59, %v724_v58 }
 0x375   : > { %v726_v62 = vmax.f32 %v725_v60, 0.0 }
 0x377   : > { %v727_v63 = vadd.f32 1e-05, %v726_v62 }
 0x379   : > { %1399 = vrsqrt.f32 %v727_v63 }
 0x383   : > { %v1400_v16 = vpop.eup %1399 }
 0x384   : > { %v735_v17 = vmul.f32 %v1400_v16, %v2170_v14 }
 0x386   : > { %v737_v19 = vmul.f32 %v735_v17, %v722_v56  ;;  %v736_v20 = vmul.f32 %v735_v17, %v714_v50 }
 0x388   : > { %v744_v21 = vsub.f32 %v2173_v18, %v737_v19 }
 0x38a   : > { %v745_v22 = vadd.f32 %v744_v21, %v736_v20 }
 0x38c   : > { %v746_v23 = vpack.c.bf16 %v745_v22, %v745_v22 }
 0x38e   : > { %1207 = vmatmul.mubr.msk.bf16.vlgmr.msra.gmra.mrb[4].mxu0 %vm556_vm1, %v746_v23  ;;  %v1155_v23 = vld [vmem:[%s2344_s12] ss:$0 sm:$0xff] }
 0x38f   : > { %1211 = vmatpush3.bf16.msra.mxu0 %v2128_v5  ;;  %1218 = vmatprep.mubr.msk.bf16.mxu0 %vm1720_vm0, %v1719_v0 }
 0x390   : > { %1212 = vmatprep.subr.bf16.mxu0 %v1719_v0 }
 0x393   : > { %1213 = vmatpush3.bf16.msra.mxu0 %v2135_v6 }
 0x394   : > { %1214 = vmatprep.subr.bf16.mxu0 %v1719_v0 }
 0x397   : > { %1215 = vmatpush3.bf16.msra.mxu0 %v2142_v7 }
 0x398   : > { %1216 = vmatprep.subr.bf16.mxu0 %v1719_v0 }
 0x39b   : > { %1217 = vmatpush3.bf16.msra.mxu0 %v2149_v8 }
 0x461   : > { %v784_v24 = vpop.f32.mrb[4].mxu0 }
 0x462   : > { %v785_v25 = vadd.f32 %v2153_v9, %v784_v24  ;;  %v1208_v26 = vpop.f32.mrb[5].mxu0 }
 0x463   : > { %v787_v5 = vpop.f32.mrb[6].mxu0 }
 0x464   : > { %v791_v27 = vmul.f32 0.70710677, %v785_v25  ;;  %v1209_v28 = vpop.f32.mrb[7].mxu0  ;;  %v790_v51 = vmul.f32 0.5, %v785_v25 }
 0x466   : > { %v1153_v29 = vclamps-f32 %v791_v27, 4.0 }
 0x468   : > { %v794_v30 = vmul.f32 %v1153_v29, %v1153_v29 }
 0x46a   : > { %v795_v31 = vmul.f32 -2.7261424e-10, %v794_v30  ;;  %v807_v32 = vmul.f32 -1.45660715e-05, %v794_v30 }
 0x46c   : > { %v796_v6 = vadd.f32 2.7706815e-08, %v795_v31  ;;  %v808_v33 = vadd.f32 -0.00021337405, %v807_v32 }
 0x46e   : > { %v797_v34 = vmul.f32 %v796_v6, %v794_v30  ;;  %v809_v35 = vmul.f32 %v808_v33, %v794_v30 }
 0x470   : > { %v798_v7 = vadd.f32 -2.101024e-06, %v797_v34  ;;  %v810_v36 = vadd.f32 -0.001682827, %v809_v35 }
 0x472   : > { %v799_v37 = vmul.f32 %v798_v7, %v794_v30  ;;  %v811_v38 = vmul.f32 %v810_v36, %v794_v30 }
 0x474   : > { %v800_v8 = vadd.f32 -5.6925062e-05, %v799_v37  ;;  %v812_v39 = vadd.f32 -0.0073733293, %v811_v38 }
 0x476   : > { %v801_v40 = vmul.f32 %v800_v8, %v794_v30  ;;  %v813_v9 = vmul.f32 %v812_v39, %v794_v30 }
 0x478   : > { %v802_v41 = vadd.f32 -0.00073499064, %v801_v40  ;;  %v814_v42 = vadd.f32 -0.014264739, %v813_v9 }
 0x47a   : > { %v803_v43 = vmul.f32 %v802_v41, %v794_v30  ;;  %1401 = vrcp.f32 %v814_v42 }
 0x47c   : > { %v804_v44 = vadd.f32 -0.0029546001, %v803_v43 }
 0x47e   : > { %v805_v46 = vmul.f32 %v804_v44, %v794_v30 }
 0x480   : > { %v806_v47 = vadd.f32 -0.016096033, %v805_v46 }
 0x482   : > { %v815_v48 = vmul.f32 %v1153_v29, %v806_v47 }
 0x484   : > { %v1402_v49 = vpop.eup %1401 }
 0x485   : > { %v817_v50 = vmul.f32 %v1402_v49, %v815_v48 }
 0x487   : > { %v818_v52 = vadd.f32 1.0, %v817_v50 }
 0x489   : > { %v819_v53 = vmul.f32 %v818_v52, %v790_v51 }
 0x48b   : > { %v820_v54 = vpack.c.bf16 %v819_v53, %v819_v53 }
 0x48d   : > { %1219 = vmatmul.mubr.msk.bf16.vlgmr.msra.gmra.mrb[8].mxu0 %vm670_vm2, %v820_v54 }
 0x560   : > { %v858_v55 = vpop.f32.mrb[8].mxu0 }
 0x561   : > { %v859_v56 = vadd.f32 %v2159_v45, %v858_v55  ;;  %v1220_v57 = vpop.f32.mrb[9].mxu0  ;;  %v1396_v45 = vld [vmem:[%s2343_s10 + $0x8] sm:$0xff]   ;;  %s2345_s10 = sld [smem:[#allocation34_spill]] }
 0x562   : > { %v861_v58 = vpop.f32.mrb[10].mxu0  ;;  %1225 = vmatpush3.bf16.msra.mxu1 %v1396_v45 }
 0x563   : > { %v864_v59 = vadd.f32 %v859_v56, %v745_v22  ;;  %v1221_v60 = vpop.f32.mrb[11].mxu0 }
 0x565   : > { %v865_v61 = vsel %vm556_vm1, %v864_v59, 0.0  ;;  %v868_v62 = vmul.f32 %v864_v59, %v864_v59 }
 0x566   : > { %866 = vadd.xlane.f32.xlu1 %v865_v61 }
 0x567   : > { %v869_v63 = vsel %vm556_vm1, %v868_v62, 0.0  ;;  %s2210_s11 = scalar_lea.hbm %s2345_s10, %s1160_s23 }
 0x56a   : > { %870 = vadd.xlane.f32.xlu1 %v869_v63 }
 0x5f3   : > { %v867_v2 = vpop.xlane.xlu1 %866 }
 0x5f4   : > { %v872_v3 = vmul.f32 0.03125, %v867_v2 }
 0x5f6   : > { %v874_v10 = vmul.f32 %v872_v3, %v872_v3 }
 0x5f7   : > { %v871_v4 = vpop.xlane.xlu1 %870 }
 0x5f8   : > { %v873_v11 = vmul.f32 0.03125, %v871_v4 }
 0x5fa   : > { %v875_v12 = vsub.f32 %v873_v11, %v874_v10 }
 0x5fc   : > { %v876_v13 = vmax.f32 %v875_v12, 0.0 }
 0x5fe   : > { %v877_v15 = vadd.f32 1e-05, %v876_v13 }
 0x600   : > { %1403 = vrsqrt.f32 %v877_v15 }
 0x60a   : > { %v1404_v16 = vpop.eup %1403 }
 0x60b   : > { %v879_v17 = vmul.f32 %v1404_v16, %v2170_v14 }
 0x60d   : > { %v881_v19 = vmul.f32 %v879_v17, %v872_v3  ;;  %v880_v20 = vmul.f32 %v879_v17, %v864_v59 }
 0x60f   : > { %v882_v0 = vsub.f32 %v2173_v18, %v881_v19 }
 0x611   : > { %v883_v21 = vadd.f32 %v882_v0, %v880_v20 }
 0x613   : > { %v884_v22 = vpack.c.bf16 %v883_v21, %v883_v21 }
 0x615   : > { %1227 = vmatmul.mubr.msk.bf16.vlgmr.msra.gmra.mrb[4].mxu1 %vm556_vm1, %v884_v22 }
 0x6e8   : > { %v945_v14 = vpop.f32.mrb[4].mxu1 }
 0x6e9   : > { %v946_v24 = vadd.f32 %v1155_v23, %v945_v14  ;;  %v1228_v25 = vpop.f32.mrb[5].mxu1 }
 0x6ea   : > { %v948_v18 = vpop.f32.mrb[6].mxu1 }
 0x6eb   : > { %951 = vst [vmem:[%s511_s24] sm:$0xff] %v946_v24  ;;  %v1229_v26 = vpop.f32.mrb[7].mxu1 }
 0x6ec   : > { %1588 = shalt.err (!%p1585_p1)
}
 0x6ed   : > { %s1589_s8 = scalar_lea.hbm %s2210_s11, 128  ;;  %s1593_s13 = scalar_lea.hbm %s2345_s10, 768 }
 0x6ee   : > { %p1590_p4 = scmp.ne.s32.totalorder %s2210_s11, %s1589_s8  ;;  %p1594_p12 = scmp.lt.u32.totalorder %s2210_s11, %s2345_s10 }
 0x6ef   : > { %p1595_p5 = scmp.lt.u32.totalorder %s1593_s13, %s1589_s8  ;;  %p1597_p6 = scmp.lt.u32.totalorder %s1589_s8, %s2210_s11 }
 0x6f0   : > { %p1591_p10 = pnand %p1590_p4, %p2346_p2 }
 0x6f1   : > { %p1596_p0 = por %p1595_p5, %p1594_p12 }
 0x6f2   : > { %p1592_p9 = pneg %p1591_p10 }
 0x6f3   : > { %p1598_p11 = por %p1597_p6, %p1596_p0 }
 0x6f5   : > { %p1599_p8 = pnand %p1598_p11, %p1592_p9 }
 0x6f7   : > { %1602 = shalt.err (!%p1599_p8)
}
 0x6f8   : > { %1254 = dma.vmem_to_hbm [thread:$0]  (%p2346_p2), %s2212_s3, 128, %s2210_s11, %s953_s4  }
 0x6f9 PF: > { %p1291_p13 = scmp.ge.s32.totalorder %s1709_s27, 2  ;;  %s980_s23 = sand.u32 1, %s1669_s17  }
 0x6fa   : > { %p2347_p3 = scmp.ne.s32.totalorder %s2330_s14, 0  ;;  %s981_s24 = scalar_lea.sflag [#allocation4], %s980_s23 }
 0x6fc   : > { %p1277_p7 = pnand %p1291_p13, %p2347_p3 }
 0x6fe   : > { %1664 = dma.done.wait (!%p1277_p7), %s981_s24, 128  }
 0x6ff   : > { %1666 = vsyncadd (!%p1277_p7), %s981_s24, 4294967168  ;;  %s30_s27 = sadd.s32 1, %s1709_s27   ;;  %s2348_s17 = smov %s1673_s18 }
 0x700   : > { %p27_p1 = scmp.ge.s32.totalorder %s30_s27, 8   ;;  %s2349_s18 = smov %s1677_s19 }
 0x701   : > { %s2350_s19 = smov %s2030_s30  ;;  %s2351_s20 = smov %s1685_s21 }
 0x702   : > { %s2352_s21 = smov %s1689_s22  ;;  %s2353_s22 = smov %s2027_s28 }
 0x703   : > { %s2354_s23 = smov %s1701_s25  ;;  %s2355_s24 = smov %s1705_s26 }
 0x704   : > { %s2356_s25 = smov %s2359_s15  ;;  %s2357_s26 = smov %s2363_s2 }
 0x705   :  { %29 = sbr.rel (!%p27_p1) target bundleno = 25 (0x19), region = 135 }
 0x70c   :  { %986 = vsyncpa [#allocation3], 1 }
 0x70d   :  { %988 = vsyncpa [#allocation3 + $0x1], 1 }
 0x70e   :  { %989 = vsyncpa [#allocation6], 1 }
 0x70f   :  { %990 = vsyncpa [#allocation9], 1 }
 0x710   :  { %991 = vsyncpa [#allocation12], 1 }
 0x711   :  { %992 = vsyncpa [#allocation4], 1 }
 0x712   :  { %994 = vsyncpa [#allocation4 + $0x1], 1 }

</bundles_post_ra>
